<compile_context>
chip_gen: v6e
topology: v6e:2x2x1
jax: 0.10.0
libtpu: 0.0.40
codegen_flags: <defaults>
</compile_context>

<pallas_src>
import math
from functools import partial

import numpy as np
import jax
import jax.numpy as jnp
from jax.experimental import pallas as pl
from jax.experimental.pallas import tpu as pltpu


def _round_up(a, b):
    return (a + b - 1) // b * b


def _cdiv(a, b):
    return (a + b - 1) // b


# --------------------------- generation-aware tuning ---------------------------

def _tpu_tuning():
    """Returns (is_v5e, big_vmem) from the attached TPU generation."""
    try:
        kind = jax.devices()[0].device_kind.lower()
    except Exception:
        kind = ""
    is_v5e = ("v5e" in kind) or ("v5 lite" in kind) or ("v5litepod" in kind)
    is_v7 = "v7" in kind
    big_vmem = (("v5" in kind) or ("v6" in kind)) and not is_v7   # 128 MiB parts
    return is_v5e, big_vmem


# ----------------------- conv path: grouped phase GEMM -------------------------

def _conv_ds_kernel(x_ref, w0_ref, w1_ref, w2_ref, w3_ref, b_ref, o_ref,
                    *, Wp_pad, C):
    """One (outC-tile, batch, row-tile) step of Conv2d(C, outC, 3, s=2, p=1).

    x_ref : ((tho+2)*Wp_pad, 4C) bf16 -- phase-interleaved activations (+halo)
    w*    : (4C|2C|2C|C, tn) bf16     -- the 9 valid taps grouped by (dy, dx)
    b_ref : (1, tn)  f32
    o_ref : (tho*Wp_pad, tn) f32
    """
    Hrows = o_ref.shape[0]
    f32 = jnp.float32
    # Each (dy, dx) window shift is a static row offset in flattened phase
    # space, applied to the *bf16 LHS* (not the f32 result).
    acc = jnp.dot(x_ref[0:Hrows, :], w0_ref[...],                      # (dy,dx)=(0,0) K=4C
                  preferred_element_type=f32)
    acc += jnp.dot(x_ref[1:1 + Hrows, 0:2 * C], w1_ref[...],           # (0,1) K=2C
                   preferred_element_type=f32)
    acc += jnp.dot(x_ref[Wp_pad:Wp_pad + Hrows, C:3 * C], w2_ref[...],  # (1,0) K=2C
                   preferred_element_type=f32)
    acc += jnp.dot(x_ref[Wp_pad + 1:Wp_pad + 1 + Hrows, C:2 * C], w3_ref[...],  # (1,1) K=C
                   preferred_element_type=f32)
    # Single store per step; bias folded in (no zero-init / finalize passes).
    o_ref[...] = (acc + b_ref[...]).astype(o_ref.dtype)


@partial(jax.jit, static_argnames=("out_C", "tn", "single_buffer", "vmem_limit"))
def _conv_forward_impl(x, w0, w1, w2, w3, bias, *, out_C, tn, single_buffer,
                       vmem_limit):
    N, C, H, W = x.shape
    Npad = bias.shape[1]
    Ho = (H - 1) // 2 + 1
    Wo = (W - 1) // 2 + 1
    ph = 2 + (H % 2)                    # pad so the padded extent is even
    pw = 2 + (W % 2)
    Hp = (H + ph) // 2                  # = Ho + 1
    Wp = (W + pw) // 2                  # = Wo + 1
    Wp_pad = _round_up(Wp, 8)           # 8-aligned row pitch in phase space

    # ---- output-row tile: bounds VMEM independent of the image size ----
    bytes_per_row = 4 * C * 2 + tn * 4            # bf16 LHS row + f32 out row
    max_rows = max(Wp_pad, (12 << 20) // (2 * bytes_per_row))
    tho = max(1, min(Ho, max_rows // Wp_pad))     # output rows per tile
    n_h = _cdiv(Ho, tho)
    R_t = (tho + 2) * Wp_pad                      # flattened rows per x tile
    Hrows = tho * Wp_pad                          # flattened rows per out tile
    J = Npad // tn
    C4 = 4 * C

    # ---- preprocessing (fused by XLA into one HBM pass) ----
    # pad 1 top/left (+zeros bottom/right), NCHW -> NHWC, split into the four
    # stride-2 phases and interleave them along channels in the order
    # [(py,px)] = [(1,0), (0,0), (0,1), (1,1)]  (matches the weight packing).
    xp = jnp.pad(x, ((0, 0), (0, 0), (1, ph - 1), (1, pw - 1)))
    xp = xp.transpose(0, 2, 3, 1)                             # (N, 2Hp, 2Wp, C)
    xp = xp.reshape(N, Hp, 2, Wp, 2, C)
    xp = jnp.stack([xp[:, :, 1, :, 0, :], xp[:, :, 0, :, 0, :],
                    xp[:, :, 0, :, 1, :], xp[:, :, 1, :, 1, :]], axis=3)
    xp = xp.reshape(N, Hp, Wp, C4)                            # (N, Hp, Wp, 4C)
    xp = jnp.pad(xp, ((0, 0), (0, 0), (0, Wp_pad - Wp), (0, 0)))
    Hp_need = n_h * tho + 2
    xp = jnp.pad(xp, ((0, 0), (0, Hp_need - Hp), (0, 0), (0, 0)))
    # Duplicate the 2-row halo per row tile (tiny) so BlockSpecs never overlap.
    xt = jnp.stack([xp[:, i * tho:i * tho + tho + 2] for i in range(n_h)],
                   axis=1)                                    # (N, n_h, tho+2, Wp_pad, 4C)
    xt = xt.reshape(N, n_h, R_t, C4).astype(jnp.bfloat16)

    def wspec(rows):
        kwargs = {}
        if single_buffer:
            # weights are re-fetched only when j changes (outermost axis) ->
            # single-buffer them to halve the largest resident VMEM block.
            kwargs["pipeline_mode"] = pl.Buffered(1)
        return pl.BlockSpec((rows, tn), lambda j, n, i: (0, j), **kwargs)

    kernel = partial(_conv_ds_kernel, Wp_pad=Wp_pad, C=C)
    y = pl.pallas_call(
        kernel,
        out_shape=jax.ShapeDtypeStruct((N, n_h, Hrows, Npad), jnp.float32),
        grid_spec=pltpu.PrefetchScalarGridSpec(
            num_scalar_prefetch=0,
            grid=(J, N, n_h),
            in_specs=[
                pl.BlockSpec((None, None, R_t, C4), lambda j, n, i: (n, i, 0, 0)),
                wspec(4 * C),
                wspec(2 * C),
                wspec(2 * C),
                wspec(C),
                pl.BlockSpec((1, tn), lambda j, n, i: (0, j)),
            ],
            out_specs=pl.BlockSpec((None, None, Hrows, tn),
                                   lambda j, n, i: (n, i, 0, j)),
        ),
        compiler_params=pltpu.CompilerParams(
            dimension_semantics=("parallel", "parallel", "parallel"),
            vmem_limit_bytes=vmem_limit,
        ),
    )(xt, w0, w1, w2, w3, bias)

    # ---- postprocessing (fused): drop padded rows/cols/channels, NHWC->NCHW ----
    y = y.reshape(N, n_h * tho, Wp_pad, Npad)[:, :Ho, :Wo, :out_C]
    return y.transpose(0, 3, 1, 2)


# ----------------------------- pool path: fused -------------------------------

def _avgpool_kernel(x_ref, p_ref, o_ref):
    # (tr, 2W) @ (2W, Wo): the 0/0.25 selection matrix performs the 2x2 average
    # and the lane compaction in one MXU op (f32, HIGHEST precision => exact
    # enough for avg-pooling); no strided HBM slices are needed.
    o_ref[...] = jnp.dot(x_ref[...], p_ref[...],
                         precision=jax.lax.Precision.HIGHEST,
                         preferred_element_type=jnp.float32).astype(o_ref.dtype)


@partial(jax.jit, static_argnames=("big_vmem",))
def _pool_forward_impl(x, *, big_vmem):
    N, C, H, W = x.shape
    Ho, Wo = H // 2, W // 2
    R = N * C * Ho
    # Free (contiguous) reshape: row r holds the two source rows of output row r.
    xr = x.reshape(R, 2 * W)
    idx = np.arange(2 * W)
    pmat = (((idx[:, None] % W) // 2) == np.arange(Wo)[None, :])
    pmat = jnp.asarray(pmat.astype(np.float32) * 0.25)        # (2W, Wo)

    cap = 2048 if big_vmem else 1024
    tr = R if R <= cap else cap
    y = pl.pallas_call(
        _avgpool_kernel,
        out_shape=jax.ShapeDtypeStruct((R, Wo), x.dtype),
        grid_spec=pltpu.PrefetchScalarGridSpec(
            num_scalar_prefetch=0,
            grid=(_cdiv(R, tr),),
            in_specs=[pl.BlockSpec((tr, 2 * W), lambda i: (i, 0)),
                      pl.BlockSpec((2 * W, Wo), lambda i: (0, 0))],
            out_specs=pl.BlockSpec((tr, Wo), lambda i: (i, 0)),
        ),
        compiler_params=pltpu.CompilerParams(
            dimension_semantics=("parallel",),
            vmem_limit_bytes=(96 << 20) if big_vmem else (48 << 20),
        ),
    )(xr, pmat)
    return y.reshape(N, C, Ho, Wo)


# ----------------------------------- module ------------------------------------

class Downsample:
    """JAX/Pallas port of the PyTorch Downsample module (NCHW in/out)."""

    def __init__(self, channels, use_conv, out_channel=None, *, key=None):
        self.channels = channels
        self.out_channel = out_channel or channels
        self.use_conv = use_conv
        self.stride = 2
        is_v5e, self.big_vmem = _tpu_tuning()
        self.vmem_limit = (96 << 20) if self.big_vmem else (48 << 20)

        if use_conv:
            key = key if key is not None else jax.random.PRNGKey(0)
            kw_, kb_ = jax.random.split(key)
            fan_in = channels * 3 * 3
            bound = 1.0 / math.sqrt(fan_in)
            # PyTorch Conv2d weight layout: (out_C, C, kh, kw)
            self.weight = jax.random.uniform(
                kw_, (self.out_channel, channels, 3, 3),
                minval=-bound, maxval=bound, dtype=jnp.float32)
            self.bias = jax.random.uniform(
                kb_, (self.out_channel,),
                minval=-bound, maxval=bound, dtype=jnp.float32)

            # ---- pack the 9 valid taps once, grouped by (dy, dx) shift ----
            Npad = _round_up(self.out_channel, 128)
            w_np = np.asarray(self.weight, dtype=np.float32)

            def tap(ky, kx):
                m = np.zeros((channels, Npad), np.float32)
                m[:, :self.out_channel] = w_np[:, :, ky, kx].T
                return m

            # LHS channel layout: phases [(py,px)] = [(1,0),(0,0),(0,1),(1,1)].
            # group (0,0): all 4 phases, taps (py,px)              -> K = 4C
            # group (0,1): px==0 phases [(1,0),(0,0)], taps (py,2) -> K = 2C
            # group (1,0): py==0 phases [(0,0),(0,1)], taps (2,px) -> K = 2C
            # group (1,1): phase (0,0), tap (2,2)                  -> K = C
            self.w0 = jnp.asarray(np.concatenate(
                [tap(1, 0), tap(0, 0), tap(0, 1), tap(1, 1)], 0), jnp.bfloat16)
            self.w1 = jnp.asarray(np.concatenate([tap(1, 2), tap(0, 2)], 0),
                                  jnp.bfloat16)
            self.w2 = jnp.asarray(np.concatenate([tap(2, 0), tap(2, 1)], 0),
                                  jnp.bfloat16)
            self.w3 = jnp.asarray(tap(2, 2), jnp.bfloat16)
            b_np = np.zeros((1, Npad), np.float32)
            b_np[0, :self.out_channel] = np.asarray(self.bias, np.float32)
            self.b_gemm = jnp.asarray(b_np)
            self.n_pad = Npad
            # v5e MXU is 128-deep: tn=256 only doubles weight/acc VMEM there.
            self.tn = 128 if (is_v5e or Npad % 256 != 0) else 256
            self._single_buf = hasattr(pl, "Buffered")
        else:
            assert self.channels == self.out_channel

    def __call__(self, x):
        assert x.shape[1] == self.channels
        if self.use_conv:
            return self._conv_forward(x)
        return self._pool_forward(x)

    # Conv2d(C, out_C, 3, stride=2, padding=1)
    def _conv_forward(self, x):
        args = (x, self.w0, self.w1, self.w2, self.w3, self.b_gemm)
        kw = dict(out_C=self.out_channel, tn=self.tn, vmem_limit=self.vmem_limit)
        if self._single_buf:
            try:
                return _conv_forward_impl(*args, single_buffer=True, **kw)
            except Exception:
                # pl.Buffered(1) not supported by this build -> default buffering.
                self._single_buf = False
        return _conv_forward_impl(*args, single_buffer=False, **kw)

    # AvgPool2d(kernel_size=2, stride=2)
    def _pool_forward(self, x):
        N, C, H, W = x.shape
        # TODO(synk): PyTorch AvgPool2d(2,2) silently truncates odd trailing
        # rows/cols; only even H/W are handled here.
        assert H % 2 == 0 and W % 2 == 0
        return _pool_forward_impl(x, big_vmem=self.big_vmem)


# ------------------------------------ main -------------------------------------

if __name__ == "__main__":
    key = jax.random.PRNGKey(0)
    kx, kp = jax.random.split(key)
    x = jax.random.normal(kx, (2, 4, 16, 16), dtype=jnp.float32)

    # --- conv path: Downsample(channels=4, use_conv=True, out_channel=8) ---
    ds_conv = Downsample(4, True, out_channel=8, key=kp)
    y_conv = jax.block_until_ready(ds_conv(x))
    assert y_conv.shape == (2, 8, 8, 8), y_conv.shape

    # reference with inputs pre-rounded to bf16 (kernel uses bf16 MXU operands,
    # f32 accumulation) -> only accumulation-order differences remain.
    xb = x.astype(jnp.bfloat16).astype(jnp.float32)
    wb = ds_conv.weight.astype(jnp.bfloat16).astype(jnp.float32)
    ref_conv = jax.lax.conv_general_dilated(
        xb, wb, window_strides=(2, 2), padding=((1, 1), (1, 1)),
        dimension_numbers=("NCHW", "OIHW", "NCHW"),
        precision=jax.lax.Precision.HIGHEST,
    ) + ds_conv.bias.reshape(1, -1, 1, 1)
    assert jnp.allclose(y_conv, ref_conv, atol=1e-2, rtol=1e-2), \
        float(jnp.max(jnp.abs(y_conv - ref_conv)))

    # --- pool path: Downsample(channels=4, use_conv=False) ---
    ds_pool = Downsample(4, False)
    y_pool = jax.block_until_ready(ds_pool(x))
    assert y_pool.shape == (2, 4, 8, 8)
    ref_pool = 0.25 * (x[:, :, 0::2, 0::2] + x[:, :, 0::2, 1::2]
                       + x[:, :, 1::2, 0::2] + x[:, :, 1::2, 1::2])
    assert jnp.allclose(y_pool, ref_pool, atol=1e-5, rtol=1e-5), \
        float(jnp.max(jnp.abs(y_pool - ref_pool)))

    print("KERNEL_OK")
</pallas_src>

<mosaic_0001>
module attributes {stable_mosaic.version = 11 : i64} {
  func.func @_conv_ds_kernel(%arg0: i32, %arg1: i32, %arg2: i32, %arg3: memref<1x1x160x16xbf16, #tpu.memory_space<vmem>>, %arg4: memref<16x128xbf16, #tpu.memory_space<vmem>>, %arg5: memref<8x128xbf16, #tpu.memory_space<vmem>>, %arg6: memref<8x128xbf16, #tpu.memory_space<vmem>>, %arg7: memref<4x128xbf16, #tpu.memory_space<vmem>>, %arg8: memref<1x128xf32, #tpu.memory_space<vmem>>, %arg9: memref<1x1x128x128xf32, #tpu.memory_space<vmem>>) attributes {dimension_semantics = [#tpu.dimension_semantics<parallel>, #tpu.dimension_semantics<parallel>, #tpu.dimension_semantics<parallel>], iteration_bounds = array<i64: 1, 2, 1>, scalar_prefetch = 0 : i64, scratch_operands = 0 : i64, tpu.core_type = #tpu.core_type<tc>, window_params = [{transform_indices = @transform_0, window_bounds = array<i64: 1, 1, 160, 16>}, {pipeline_mode = #tpu.pipeline_mode<synchronous>, transform_indices = @transform_1, window_bounds = array<i64: 16, 128>}, {pipeline_mode = #tpu.pipeline_mode<synchronous>, transform_indices = @transform_2, window_bounds = array<i64: 8, 128>}, {pipeline_mode = #tpu.pipeline_mode<synchronous>, transform_indices = @transform_3, window_bounds = array<i64: 8, 128>}, {pipeline_mode = #tpu.pipeline_mode<synchronous>, transform_indices = @transform_4, window_bounds = array<i64: 4, 128>}, {transform_indices = @transform_5, window_bounds = array<i64: 1, 128>}, {transform_indices = @transform_6, window_bounds = array<i64: 1, 1, 128, 128>}]} {
    %c0 = arith.constant 0 : index
    %c0_0 = arith.constant 0 : index
    %c0_1 = arith.constant 0 : index
    %c0_2 = arith.constant 0 : index
    %0 = vector.load %arg3[%c0, %c0_0, %c0_1, %c0_2] : memref<1x1x160x16xbf16, #tpu.memory_space<vmem>>, vector<1x1x128x16xbf16>
    %1 = vector.shape_cast %0 : vector<1x1x128x16xbf16> to vector<128x16xbf16>
    %c0_3 = arith.constant 0 : index
    %c0_4 = arith.constant 0 : index
    %2 = vector.load %arg4[%c0_3, %c0_4] : memref<16x128xbf16, #tpu.memory_space<vmem>>, vector<16x128xbf16>
    %cst = arith.constant dense<0.000000e+00> : vector<128x128xf32>
    %3 = tpu.matmul %1, %2, %cst {dimension_numbers = #tpu.dot_dimension_numbers<[1], [0], [0], [1], [0, 0, 1, 1], [], []>} : vector<128x16xbf16>, vector<16x128xbf16>, vector<128x128xf32> -> vector<128x128xf32>
    %c0_5 = arith.constant 0 : index
    %c0_6 = arith.constant 0 : index
    %c1 = arith.constant 1 : index
    %c0_7 = arith.constant 0 : index
    %4 = vector.load %arg3[%c0_5, %c0_6, %c1, %c0_7] : memref<1x1x160x16xbf16, #tpu.memory_space<vmem>>, vector<1x1x128x8xbf16>
    %5 = vector.shape_cast %4 : vector<1x1x128x8xbf16> to vector<128x8xbf16>
    %c0_8 = arith.constant 0 : index
    %c0_9 = arith.constant 0 : index
    %6 = vector.load %arg5[%c0_8, %c0_9] : memref<8x128xbf16, #tpu.memory_space<vmem>>, vector<8x128xbf16>
    %cst_10 = arith.constant dense<0.000000e+00> : vector<128x128xf32>
    %7 = tpu.matmul %5, %6, %cst_10 {dimension_numbers = #tpu.dot_dimension_numbers<[1], [0], [0], [1], [0, 0, 1, 1], [], []>} : vector<128x8xbf16>, vector<8x128xbf16>, vector<128x128xf32> -> vector<128x128xf32>
    %8 = arith.addf %3, %7 : vector<128x128xf32>
    %c0_11 = arith.constant 0 : index
    %c0_12 = arith.constant 0 : index
    %c16 = arith.constant 16 : index
    %c4 = arith.constant 4 : index
    %9 = vector.load %arg3[%c0_11, %c0_12, %c16, %c4] : memref<1x1x160x16xbf16, #tpu.memory_space<vmem>>, vector<1x1x128x8xbf16>
    %10 = vector.shape_cast %9 : vector<1x1x128x8xbf16> to vector<128x8xbf16>
    %c0_13 = arith.constant 0 : index
    %c0_14 = arith.constant 0 : index
    %11 = vector.load %arg6[%c0_13, %c0_14] : memref<8x128xbf16, #tpu.memory_space<vmem>>, vector<8x128xbf16>
    %cst_15 = arith.constant dense<0.000000e+00> : vector<128x128xf32>
    %12 = tpu.matmul %10, %11, %cst_15 {dimension_numbers = #tpu.dot_dimension_numbers<[1], [0], [0], [1], [0, 0, 1, 1], [], []>} : vector<128x8xbf16>, vector<8x128xbf16>, vector<128x128xf32> -> vector<128x128xf32>
    %13 = arith.addf %8, %12 : vector<128x128xf32>
    %c0_16 = arith.constant 0 : index
    %c0_17 = arith.constant 0 : index
    %c17 = arith.constant 17 : index
    %c4_18 = arith.constant 4 : index
    %14 = vector.load %arg3[%c0_16, %c0_17, %c17, %c4_18] : memref<1x1x160x16xbf16, #tpu.memory_space<vmem>>, vector<1x1x128x4xbf16>
    %15 = vector.shape_cast %14 : vector<1x1x128x4xbf16> to vector<128x4xbf16>
    %c0_19 = arith.constant 0 : index
    %c0_20 = arith.constant 0 : index
    %16 = vector.load %arg7[%c0_19, %c0_20] : memref<4x128xbf16, #tpu.memory_space<vmem>>, vector<4x128xbf16>
    %cst_21 = arith.constant dense<0.000000e+00> : vector<128x128xf32>
    %17 = tpu.matmul %15, %16, %cst_21 {dimension_numbers = #tpu.dot_dimension_numbers<[1], [0], [0], [1], [0, 0, 1, 1], [], []>} : vector<128x4xbf16>, vector<4x128xbf16>, vector<128x128xf32> -> vector<128x128xf32>
    %18 = arith.addf %13, %17 : vector<128x128xf32>
    %c0_22 = arith.constant 0 : index
    %c0_23 = arith.constant 0 : index
    %19 = vector.load %arg8[%c0_22, %c0_23] : memref<1x128xf32, #tpu.memory_space<vmem>>, vector<1x128xf32>
    %20 = vector.broadcast %19 : vector<1x128xf32> to vector<128x128xf32>
    %21 = arith.addf %18, %20 : vector<128x128xf32>
    %c0_24 = arith.constant 0 : index
    %c0_25 = arith.constant 0 : index
    %c0_26 = arith.constant 0 : index
    %c0_27 = arith.constant 0 : index
    %22 = vector.load %arg9[%c0_24, %c0_25, %c0_26, %c0_27] : memref<1x1x128x128xf32, #tpu.memory_space<vmem>>, vector<1x1x128x128xf32>
    %23 = vector.shape_cast %22 : vector<1x1x128x128xf32> to vector<128x128xf32>
    %24 = vector.shape_cast %21 : vector<128x128xf32> to vector<1x1x128x128xf32>
    tpu.vector_store %arg9[%c0_24, %c0_25, %c0_26, %c0_27], %24 {strides = array<i32>} : memref<1x1x128x128xf32, #tpu.memory_space<vmem>>, vector<1x1x128x128xf32>,
    return
  }
  func.func @transform_0(%arg0: i32, %arg1: i32, %arg2: i32) -> (i32, i32, i32, i32) {
    %c0_i32 = arith.constant 0 : i32
    %c0_i32_0 = arith.constant 0 : i32
    %c0_i32_1 = arith.constant 0 : i32
    return %arg1, %arg2, %c0_i32, %c0_i32_0 : i32, i32, i32, i32
  }
  func.func @transform_1(%arg0: i32, %arg1: i32, %arg2: i32) -> (i32, i32) {
    %c0_i32 = arith.constant 0 : i32
    %c0_i32_0 = arith.constant 0 : i32
    return %c0_i32, %arg0 : i32, i32
  }
  func.func @transform_2(%arg0: i32, %arg1: i32, %arg2: i32) -> (i32, i32) {
    %c0_i32 = arith.constant 0 : i32
    %c0_i32_0 = arith.constant 0 : i32
    return %c0_i32, %arg0 : i32, i32
  }
  func.func @transform_3(%arg0: i32, %arg1: i32, %arg2: i32) -> (i32, i32) {
    %c0_i32 = arith.constant 0 : i32
    %c0_i32_0 = arith.constant 0 : i32
    return %c0_i32, %arg0 : i32, i32
  }
  func.func @transform_4(%arg0: i32, %arg1: i32, %arg2: i32) -> (i32, i32) {
    %c0_i32 = arith.constant 0 : i32
    %c0_i32_0 = arith.constant 0 : i32
    return %c0_i32, %arg0 : i32, i32
  }
  func.func @transform_5(%arg0: i32, %arg1: i32, %arg2: i32) -> (i32, i32) {
    %c0_i32 = arith.constant 0 : i32
    %c0_i32_0 = arith.constant 0 : i32
    return %c0_i32, %arg0 : i32, i32
  }
  func.func @transform_6(%arg0: i32, %arg1: i32, %arg2: i32) -> (i32, i32, i32, i32) {
    %c0_i32 = arith.constant 0 : i32
    %c0_i32_0 = arith.constant 0 : i32
    return %arg1, %arg2, %c0_i32, %arg0 : i32, i32, i32, i32
  }
}

module attributes {stable_mosaic.version = 11 : i64} {
  func.func @_conv_ds_kernel(%arg0: i32, %arg1: i32, %arg2: i32, %arg3: memref<1x1x160x16xbf16, #tpu.memory_space<vmem>>, %arg4: memref<16x128xbf16, #tpu.memory_space<vmem>>, %arg5: memref<8x128xbf16, #tpu.memory_space<vmem>>, %arg6: memref<8x128xbf16, #tpu.memory_space<vmem>>, %arg7: memref<4x128xbf16, #tpu.memory_space<vmem>>, %arg8: memref<1x128xf32, #tpu.memory_space<vmem>>, %arg9: memref<1x1x128x128xf32, #tpu.memory_space<vmem>>) attributes {dimension_semantics = [#tpu.dimension_semantics<parallel>, #tpu.dimension_semantics<parallel>, #tpu.dimension_semantics<parallel>], iteration_bounds = array<i64: 1, 2, 1>, scalar_prefetch = 0 : i64, scratch_operands = 0 : i64, tpu.core_type = #tpu.core_type<tc>, window_params = [{transform_indices = @transform_0, window_bounds = array<i64: 1, 1, 160, 16>}, {transform_indices = @transform_1, window_bounds = array<i64: 16, 128>}, {transform_indices = @transform_2, window_bounds = array<i64: 8, 128>}, {transform_indices = @transform_3, window_bounds = array<i64: 8, 128>}, {transform_indices = @transform_4, window_bounds = array<i64: 4, 128>}, {transform_indices = @transform_5, window_bounds = array<i64: 1, 128>}, {transform_indices = @transform_6, window_bounds = array<i64: 1, 1, 128, 128>}]} {
    %c0 = arith.constant 0 : index
    %c0_0 = arith.constant 0 : index
    %c0_1 = arith.constant 0 : index
    %c0_2 = arith.constant 0 : index
    %0 = vector.load %arg3[%c0, %c0_0, %c0_1, %c0_2] : memref<1x1x160x16xbf16, #tpu.memory_space<vmem>>, vector<1x1x128x16xbf16>
    %1 = vector.shape_cast %0 : vector<1x1x128x16xbf16> to vector<128x16xbf16>
    %c0_3 = arith.constant 0 : index
    %c0_4 = arith.constant 0 : index
    %2 = vector.load %arg4[%c0_3, %c0_4] : memref<16x128xbf16, #tpu.memory_space<vmem>>, vector<16x128xbf16>
    %cst = arith.constant dense<0.000000e+00> : vector<128x128xf32>
    %3 = tpu.matmul %1, %2, %cst {dimension_numbers = #tpu.dot_dimension_numbers<[1], [0], [0], [1], [0, 0, 1, 1], [], []>} : vector<128x16xbf16>, vector<16x128xbf16>, vector<128x128xf32> -> vector<128x128xf32>
    %c0_5 = arith.constant 0 : index
    %c0_6 = arith.constant 0 : index
    %c1 = arith.constant 1 : index
    %c0_7 = arith.constant 0 : index
    %4 = vector.load %arg3[%c0_5, %c0_6, %c1, %c0_7] : memref<1x1x160x16xbf16, #tpu.memory_space<vmem>>, vector<1x1x128x8xbf16>
    %5 = vector.shape_cast %4 : vector<1x1x128x8xbf16> to vector<128x8xbf16>
    %c0_8 = arith.constant 0 : index
    %c0_9 = arith.constant 0 : index
    %6 = vector.load %arg5[%c0_8, %c0_9] : memref<8x128xbf16, #tpu.memory_space<vmem>>, vector<8x128xbf16>
    %cst_10 = arith.constant dense<0.000000e+00> : vector<128x128xf32>
    %7 = tpu.matmul %5, %6, %cst_10 {dimension_numbers = #tpu.dot_dimension_numbers<[1], [0], [0], [1], [0, 0, 1, 1], [], []>} : vector<128x8xbf16>, vector<8x128xbf16>, vector<128x128xf32> -> vector<128x128xf32>
    %8 = arith.addf %3, %7 : vector<128x128xf32>
    %c0_11 = arith.constant 0 : index
    %c0_12 = arith.constant 0 : index
    %c16 = arith.constant 16 : index
    %c4 = arith.constant 4 : index
    %9 = vector.load %arg3[%c0_11, %c0_12, %c16, %c4] : memref<1x1x160x16xbf16, #tpu.memory_space<vmem>>, vector<1x1x128x8xbf16>
    %10 = vector.shape_cast %9 : vector<1x1x128x8xbf16> to vector<128x8xbf16>
    %c0_13 = arith.constant 0 : index
    %c0_14 = arith.constant 0 : index
    %11 = vector.load %arg6[%c0_13, %c0_14] : memref<8x128xbf16, #tpu.memory_space<vmem>>, vector<8x128xbf16>
    %cst_15 = arith.constant dense<0.000000e+00> : vector<128x128xf32>
    %12 = tpu.matmul %10, %11, %cst_15 {dimension_numbers = #tpu.dot_dimension_numbers<[1], [0], [0], [1], [0, 0, 1, 1], [], []>} : vector<128x8xbf16>, vector<8x128xbf16>, vector<128x128xf32> -> vector<128x128xf32>
    %13 = arith.addf %8, %12 : vector<128x128xf32>
    %c0_16 = arith.constant 0 : index
    %c0_17 = arith.constant 0 : index
    %c17 = arith.constant 17 : index
    %c4_18 = arith.constant 4 : index
    %14 = vector.load %arg3[%c0_16, %c0_17, %c17, %c4_18] : memref<1x1x160x16xbf16, #tpu.memory_space<vmem>>, vector<1x1x128x4xbf16>
    %15 = vector.shape_cast %14 : vector<1x1x128x4xbf16> to vector<128x4xbf16>
    %c0_19 = arith.constant 0 : index
    %c0_20 = arith.constant 0 : index
    %16 = vector.load %arg7[%c0_19, %c0_20] : memref<4x128xbf16, #tpu.memory_space<vmem>>, vector<4x128xbf16>
    %cst_21 = arith.constant dense<0.000000e+00> : vector<128x128xf32>
    %17 = tpu.matmul %15, %16, %cst_21 {dimension_numbers = #tpu.dot_dimension_numbers<[1], [0], [0], [1], [0, 0, 1, 1], [], []>} : vector<128x4xbf16>, vector<4x128xbf16>, vector<128x128xf32> -> vector<128x128xf32>
    %18 = arith.addf %13, %17 : vector<128x128xf32>
    %c0_22 = arith.constant 0 : index
    %c0_23 = arith.constant 0 : index
    %19 = vector.load %arg8[%c0_22, %c0_23] : memref<1x128xf32, #tpu.memory_space<vmem>>, vector<1x128xf32>
    %20 = vector.broadcast %19 : vector<1x128xf32> to vector<128x128xf32>
    %21 = arith.addf %18, %20 : vector<128x128xf32>
    %c0_24 = arith.constant 0 : index
    %c0_25 = arith.constant 0 : index
    %c0_26 = arith.constant 0 : index
    %c0_27 = arith.constant 0 : index
    %22 = vector.load %arg9[%c0_24, %c0_25, %c0_26, %c0_27] : memref<1x1x128x128xf32, #tpu.memory_space<vmem>>, vector<1x1x128x128xf32>
    %23 = vector.shape_cast %22 : vector<1x1x128x128xf32> to vector<128x128xf32>
    %24 = vector.shape_cast %21 : vector<128x128xf32> to vector<1x1x128x128xf32>
    tpu.vector_store %arg9[%c0_24, %c0_25, %c0_26, %c0_27], %24 {strides = array<i32>} : memref<1x1x128x128xf32, #tpu.memory_space<vmem>>, vector<1x1x128x128xf32>,
    return
  }
  func.func @transform_0(%arg0: i32, %arg1: i32, %arg2: i32) -> (i32, i32, i32, i32) {
    %c0_i32 = arith.constant 0 : i32
    %c0_i32_0 = arith.constant 0 : i32
    %c0_i32_1 = arith.constant 0 : i32
    return %arg1, %arg2, %c0_i32, %c0_i32_0 : i32, i32, i32, i32
  }
  func.func @transform_1(%arg0: i32, %arg1: i32, %arg2: i32) -> (i32, i32) {
    %c0_i32 = arith.constant 0 : i32
    %c0_i32_0 = arith.constant 0 : i32
    return %c0_i32, %arg0 : i32, i32
  }
  func.func @transform_2(%arg0: i32, %arg1: i32, %arg2: i32) -> (i32, i32) {
    %c0_i32 = arith.constant 0 : i32
    %c0_i32_0 = arith.constant 0 : i32
    return %c0_i32, %arg0 : i32, i32
  }
  func.func @transform_3(%arg0: i32, %arg1: i32, %arg2: i32) -> (i32, i32) {
    %c0_i32 = arith.constant 0 : i32
    %c0_i32_0 = arith.constant 0 : i32
    return %c0_i32, %arg0 : i32, i32
  }
  func.func @transform_4(%arg0: i32, %arg1: i32, %arg2: i32) -> (i32, i32) {
    %c0_i32 = arith.constant 0 : i32
    %c0_i32_0 = arith.constant 0 : i32
    return %c0_i32, %arg0 : i32, i32
  }
  func.func @transform_5(%arg0: i32, %arg1: i32, %arg2: i32) -> (i32, i32) {
    %c0_i32 = arith.constant 0 : i32
    %c0_i32_0 = arith.constant 0 : i32
    return %c0_i32, %arg0 : i32, i32
  }
  func.func @transform_6(%arg0: i32, %arg1: i32, %arg2: i32) -> (i32, i32, i32, i32) {
    %c0_i32 = arith.constant 0 : i32
    %c0_i32_0 = arith.constant 0 : i32
    return %arg1, %arg2, %c0_i32, %arg0 : i32, i32, i32, i32
  }
}

</mosaic_0001>

<bundles_post_ra>
// kernel: _conv_forward_impl.1
= control target key start
LH: loop header
LB: loop body
LE: loop exit
PB: predicated region body
PF: predicated region fallthrough
CT: control target
= control target key end

     0   :  { %s1781_s21 = smov 0   ;;  %s1783_s22 = smov 0   ;;  %s2024_s0 = inlined_call_operand.vmem [shape: bf16[2,1,160,16], index: 0, kind: input, shape index: {}]   ;;  %s2025_s1 = inlined_call_operand.vmem [shape: bf16[16,128], index: 1, kind: input, shape index: {}]   ;;  %s2026_s2 = inlined_call_operand.vmem [shape: bf16[8,128], index: 2, kind: input, shape index: {}]   ;;  %s2027_s3 = inlined_call_operand.vmem [shape: bf16[8,128], index: 3, kind: input, shape index: {}]   ;;  %s2028_s4 = inlined_call_operand.vmem [shape: bf16[4,128], index: 4, kind: input, shape index: {}]   ;;  %s2029_s5 = inlined_call_operand.vmem [shape: f32[1,128], index: 5, kind: input, shape index: {}]   ;;  %s2030_s6 = inlined_call_operand.vmem [shape: f32[2,1,128,128], index: 6, kind: output, shape index: {}]  }
   0x1   :  { %s1785_s23 = smov 0  }
   0x2 LB: > { %s31_s24 = sadd.s32 1, %s1739_s22  ;;  %p1490_p0 = scmp.ge.s32.totalorder %s1743_s23, 1  ;;  %s1743_s23 = sphi %s1785_s23, %s16_s23   ;;  %s1739_s22 = sphi %s1783_s22, %s2032_s22   ;;  %s1735_s21 = sphi %s1781_s21, %s2031_s21  }
   0x3   : > { %p33_p1 = scmp.ge.s32.totalorder %s31_s24, 2  ;;  %p285_p2 = scmp.lt.s32.totalorder %s1743_s23, 3 }
   0x5   : > { %s2034_s24 = smov (%p33_p1, %s31_s24), 0  ;;  %p286_p3 = pnand %p1490_p0, %p285_p2 }
   0x6   : > { %p345_p4 = scmp.lt.s32.totalorder (!%p286_p3), %s1735_s21, 1  ;;  %s1745_s13 = smov (!%p286_p3), 124  }
   0x7   : > { %289 = sbr.rel (%p286_p3) target bundleno = 372 (0x174), region = 44 }
   0xc   : > { %v405_v0 = vld [vmem:[%s2026_s2] sm:$0xf]  ;;  %vm543_vm0 = vcmask 1043456   ;;  %s2036_s21 = smov (!%p345_p4, %s1735_s21), 1  ;;  %vm1147_vm1 = vcmask 1041408   ;;  %vm650_vm3 = vcmask 130048  }
   0xd   : > { %v1711_v1 = vld [vmem:[%s2025_s1] sm:$0xff]   ;;  %1665 = vmatprep.subr.msk.bf16.mxu0 %vm543_vm0, %v405_v0  ;;  %v545_v2 = vsel %vm543_vm0, %v405_v0, 0  ;;  %s1668_s9 = smul.u32 80, %s2036_s21  ;;  %vm449_vm2 = vsmask.f32 7424  ;;  %vm518_vm4 = vcmask 64512  }
   0xe   : > { %v1812_v3 = vld [vmem:[%s2027_s3] sm:$0xf]  ;;  %1611 = vmatprep.subr.bf16.mxu1 %v1711_v1  ;;  %1594 = vmatpush3.bf16.msra.mxu0 %v545_v2  ;;  %vm1122_vm5 = vcmask 31744   ;;  %s1556_s14 = sshll.u32 %s2036_s21, 7 }
   0xf   : > { %v1817_v4 = vld [vmem:[%s2028_s4] sm:$0x3]  ;;  %1612 = vmatpush3.bf16.msra.mxu1 %v1711_v1  ;;  %1666 = vmatprep.subr.msk.bf16.mxu0 %vm543_vm0, %v1812_v3  ;;  %s1827_s12 = scalar_lea.vmem %s2024_s0, %s1668_s9  ;;  %s1966_s19 = scalar_lea.vmem %s2030_s6, %s1556_s14 }
  0x10   : > { %1667 = vmatprep.subr.msk.bf16.mxu1 %vm1147_vm1, %v1817_v4  ;;  %v1694_v5 = vld [vmem:[%s1827_s12 + $0x8] sm:$0xff]   ;;  %v1695_v6 = vld [vmem:[%s1827_s12 + $0x10] sm:$0xff]   ;;  %v1698_v9 = vld [vmem:[%s1827_s12 + $0x18] sm:$0xff]   ;;  %v1149_v54 = vsel %vm1147_vm1, %v1817_v4, 0 }
  0x11   : > { %821 = vrot.lane.b32.xlu0 %v1694_v5, %s1745_s13  ;;  %v1696_v7 = vld [vmem:[%s1827_s12 + $0x8] sm:$0xff]   ;;  %v1697_v8 = vld [vmem:[%s1827_s12 + $0x10] sm:$0xff]   ;;  %v1054_v14 = vshll.u32 %v1698_v9, 16  ;;  %v1699_v15 = vld [vmem:[%s1827_s12 + $0x18] sm:$0xff]   ;;  %v1058_v20 = vshrl.u32 %v1698_v9, 16 }
  0x12   : > { %v1039_v10 = vshrl.u32 %v1696_v7, 16  ;;  %v1041_v11 = vshll.u32 %v1696_v7, 16  ;;  %v1046_v12 = vshll.u32 %v1697_v8, 16  ;;  %v1050_v13 = vshrl.u32 %v1697_v8, 16  ;;  %v1701_v18 = vld [vmem:[%s1827_s12 + $0x20] sm:$0xff]   ;;  %v1702_v24 = vld [vmem:[%s1827_s12 + $0x28] sm:$0xff]  }
  0x13   : > { %v1056_v19 = vrot.slane %v1054_v14, 1  ;;  %v1062_v23 = vshll.u32 %v1701_v18, 16  ;;  %v1066_v26 = vshrl.u32 %v1701_v18, 16  ;;  %v1070_v29 = vshll.u32 %v1702_v24, 16  ;;  %v1703_v30 = vld [vmem:[%s1827_s12 + $0x28] sm:$0xff]   ;;  %v1705_v35 = vld [vmem:[%s1827_s12 + $0x30] sm:$0xff]  }
  0x14   : > { %v1043_v16 = vrot.slane %v1041_v11, 1  ;;  %v1048_v17 = vrot.slane %v1046_v12, 1  ;;  %v1074_v31 = vshrl.u32 %v1702_v24, 16  ;;  %v1706_v36 = vld [vmem:[%s1827_s12 + $0x38] sm:$0xff]   ;;  %v1700_v37 = vld [vmem:[%s1827_s12 + $0x20] sm:$0xff]   ;;  %v1078_v39 = vshll.u32 %v1705_v35, 16 }
  0x15   : > { %823 = vrot.lane.b32.xlu0 %v1695_v6, %s1745_s13  ;;  %v1060_v25 = vor.u32 %v1058_v20, %v1056_v19  ;;  %v1064_v28 = vrot.slane %v1062_v23, 1  ;;  %v1072_v34 = vrot.slane %v1070_v29, 1  ;;  %v1086_v40 = vshll.u32 %v1706_v36, 16  ;;  %v1851_v41 = vld [vmem:[%s1827_s12 + $0x40] sm:$0xff]   ;;  %v1707_v49 = vld [vmem:[%s1827_s12 + $0x38] sm:$0xff]   ;;  %v1713_v51 = vld [vmem:[%s1827_s12 + $0x8] sm:$0xff]  }
  0x16   : > { %v1044_v21 = vor.u32 %v1043_v16, %v1039_v10  ;;  %v1052_v22 = vor.u32 %v1050_v13, %v1048_v17  ;;  %v1080_v43 = vrot.slane %v1078_v39, 1  ;;  %v1090_v44 = vshrl.u32 %v1706_v36, 16  ;;  %v1712_v50 = vld [vmem:[%s1827_s12] sm:$0xff]   ;;  %v1714_v53 = vld [vmem:[%s1827_s12 + $0x10] sm:$0xff]   ;;  %v1715_v0 = vld [vmem:[%s1827_s12 + $0x18] sm:$0xff]  }
  0x17   : > { %v1065_v33 = vsel %vm449_vm2, %v1060_v25, %v1064_v28  ;;  %v1076_v38 = vor.u32 %v1074_v31, %v1072_v34  ;;  %v1068_v42 = vor.u32 %v1066_v26, %v1064_v28  ;;  %v1094_v45 = vshll.u32 %v1851_v41, 16  ;;  %v1704_v55 = vld [vmem:[%s1827_s12 + $0x30] sm:$0xff]   ;;  %v1710_v58 = vld [vmem:[%s1827_s12 + $0x48] ss:$0 sps:$4 sm:$0x11]   ;;  %1613 = vmatprep.mubr.msk.bf16.mxu1 %vm650_vm3, %v1712_v50  ;;  %v1716_v1 = vld [vmem:[%s1827_s12 + $0x20] sm:$0xff]  }
  0x18   : > { %v1049_v27 = vsel %vm449_vm2, %v1044_v21, %v1048_v17  ;;  %v1057_v32 = vsel %vm449_vm2, %v1052_v22, %v1056_v19  ;;  %v1082_v47 = vshrl.u32 %v1705_v35, 16  ;;  %v1088_v48 = vrot.slane %v1086_v40, 1  ;;  %1614 = vmatmul.mubr.msk.bf16.vlgmr.msra.gmra.mxu1 %vm650_vm3, %v1713_v51  ;;  %v1717_v5 = vld [vmem:[%s1827_s12 + $0x28] sm:$0xff]   ;;  %v1718_v26 = vld [vmem:[%s1827_s12 + $0x30] sm:$0xff]  }
  0x19   : > { %825 = vrot.lane.b32.xlu0 %v1699_v15, %s1745_s13  ;;  %1106 = vrot.lane.b32.xlu1 %v1049_v27, %s1745_s13  ;;  %v1081_v46 = vsel %vm449_vm2, %v1076_v38, %v1080_v43  ;;  %v1073_v52 = vsel %vm449_vm2, %v1068_v42, %v1072_v34  ;;  %v1096_v57 = vrot.slane %v1094_v45, 1  ;;  %v451_v59 = vshrl.u32 %v1712_v50, 16  ;;  %v1708_v27 = vld [vmem:[%s1827_s12 + $0x40] sm:$0xff]  }
  0x1a   : > { %v1092_v56 = vor.u32 %v1090_v44, %v1088_v48  ;;  %v453_v60 = vshll.u32 %v1712_v50, 16  ;;  %v458_v61 = vshll.u32 %v1713_v51, 16  ;;  %v462_v62 = vshrl.u32 %v1713_v51, 16  ;;  %1617 = vmatprep.mubr.msk.bf16.mxu1 %vm650_vm3, %v1714_v53  ;;  %1648 = vmatpush3.bf16.msra.mxu1 %v1149_v54 }
  0x1b   : > { %v466_v63 = vshll.u32 %v1714_v53, 16  ;;  %v1084_v2 = vor.u32 %v1082_v47, %v1080_v43  ;;  %v470_v4 = vshrl.u32 %v1714_v53, 16  ;;  %v474_v9 = vshll.u32 %v1715_v0, 16  ;;  %v1720_v43 = vld [vmem:[%s1827_s12 + $0x40] ss:$0 sps:$4 sm:$0x11]  }
  0x1c   : > { %v455_v6 = vrot.slane %v453_v60, 1  ;;  %v460_v7 = vrot.slane %v458_v61, 1  ;;  %v1097_v10 = vsel %vm449_vm2, %v1092_v56, %v1096_v57  ;;  %v862_v11 = vsel %vm543_vm0, %v1812_v3, 0 }
  0x1d   : > { %1110 = vrot.lane.b32.xlu0 %v1065_v33, %s1745_s13  ;;  %1108 = vrot.lane.b32.xlu1 %v1057_v32, %s1745_s13  ;;  %v468_v8 = vrot.slane %v466_v63, 1  ;;  %v482_v12 = vshll.u32 %v1716_v1, 16  ;;  %v476_v16 = vrot.slane %v474_v9, 1  ;;  %v1089_v17 = vsel %vm449_vm2, %v1084_v2, %v1088_v48  ;;  %v1719_v33 = vld [vmem:[%s1827_s12 + $0x38] sm:$0xff]  }
  0x1e   : > { %v456_v13 = vor.u32 %v455_v6, %v451_v59  ;;  %v464_v14 = vor.u32 %v462_v62, %v460_v7  ;;  %v1098_v18 = vshrl.u32 %v1851_v41, 16  ;;  %v1102_v19 = vshll.u32 %v1710_v58, 16 }
  0x1f   : > { %v472_v15 = vor.u32 %v470_v4, %v468_v8  ;;  %v478_v20 = vshrl.u32 %v1715_v0, 16  ;;  %v486_v3 = vshrl.u32 %v1716_v1, 16  ;;  %v490_v23 = vshll.u32 %v1717_v5, 16 }
  0x20   : > { %v461_v21 = vsel %vm449_vm2, %v456_v13, %v460_v7  ;;  %v469_v22 = vsel %vm449_vm2, %v464_v14, %v468_v8  ;;  %v484_v25 = vrot.slane %v482_v12, 1  ;;  %1618 = vmatmul.mubr.msk.bf16.gmra.mxu1 %vm650_vm3, %v1715_v0  ;;  %v1100_v29 = vor.u32 %v1098_v18, %v1096_v57 }
  0x21   : > { %829 = vrot.lane.b32.xlu0 %v1703_v30, %s1745_s13  ;;  %827 = vrot.lane.b32.xlu1 %v1700_v37, %s1745_s13  ;;  %v477_v24 = vsel %vm449_vm2, %v472_v15, %v476_v16  ;;  %v480_v28 = vor.u32 %v478_v20, %v476_v16  ;;  %v1104_v30 = vrot.slane %v1102_v19, 1  ;;  %v492_v32 = vrot.slane %v490_v23, 1 }
  0x22   : > { %1595 = vmatprep.mubr.msk.bf16.mxu0 %vm518_vm4, %v461_v21  ;;  %v488_v31 = vor.u32 %v486_v3, %v484_v25  ;;  %1621 = vmatprep.mubr.msk.bf16.mxu1 %vm650_vm3, %v1716_v1  ;;  %v498_v34 = vshll.u32 %v1718_v26, 16  ;;  %v494_v36 = vshrl.u32 %v1717_v5, 16  ;;  %v502_v39 = vshrl.u32 %v1718_v26, 16 }
  0x23   : > { %1596 = vmatmul.mubr.msk.bf16.vlgmr.msra.gmra.mxu0 %vm518_vm4, %v469_v22  ;;  %v485_v35 = vsel %vm449_vm2, %v480_v28, %v484_v25  ;;  %v1105_v37 = vsel %vm449_vm2, %v1100_v29, %v1104_v30  ;;  %v506_v40 = vshll.u32 %v1719_v33, 16  ;;  %v510_v47 = vshrl.u32 %v1719_v33, 16 }
  0x24   : > { %1630 = vmatpush3.bf16.msra.mxu0 %v862_v11  ;;  %1599 = vmatprep.mubr.msk.bf16.mxu0 %vm518_vm4, %v477_v24  ;;  %v493_v38 = vsel %vm449_vm2, %v488_v31, %v492_v32  ;;  %v500_v41 = vrot.slane %v498_v34, 1  ;;  %v496_v42 = vor.u32 %v494_v36, %v492_v32  ;;  %v514_v48 = vshll.u32 %v1720_v43, 16 }
  0x25   : > { %1114 = vrot.lane.b32.xlu0 %v1081_v46, %s1745_s13  ;;  %1112 = vrot.lane.b32.xlu1 %v1073_v52, %s1745_s13  ;;  %v508_v45 = vrot.slane %v506_v40, 1 }
  0x26   : > { %v504_v44 = vor.u32 %v502_v39, %v500_v41  ;;  %v501_v46 = vsel %vm449_vm2, %v496_v42, %v500_v41  ;;  %v516_v51 = vrot.slane %v514_v48, 1 }
  0x27   : > { %v512_v50 = vor.u32 %v510_v47, %v508_v45 }
  0x28   : > { %1622 = vmatmul.mubr.msk.bf16.gmra.mxu1 %vm650_vm3, %v1717_v5 }
  0x29   : > { %833 = vrot.lane.b32.xlu0 %v1707_v49, %s1745_s13  ;;  %831 = vrot.lane.b32.xlu1 %v1704_v55, %s1745_s13  ;;  %v509_v49 = vsel %vm449_vm2, %v504_v44, %v508_v45  ;;  %v517_v52 = vsel %vm449_vm2, %v512_v50, %v516_v51  ;;  %v1961_v44 = vld [vmem:[%s2029_s5] ss:$0 sm:$0xff] }
  0x2a   : > { %1625 = vmatprep.mubr.msk.bf16.mxu1 %vm650_vm3, %v1718_v26 }
  0x2b   : > { %1600 = vmatmul.mubr.msk.bf16.gmra.mxu0 %vm518_vm4, %v485_v35 }
  0x2c   : > { %1603 = vmatprep.mubr.msk.bf16.mxu0 %vm518_vm4, %v493_v38 }
  0x2d   : > { %1118 = vrot.lane.b32.xlu0 %v1097_v10, %s1745_s13  ;;  %1116 = vrot.lane.b32.xlu1 %v1089_v17, %s1745_s13 }
  0x30   : > { %1626 = vmatmul.mubr.msk.bf16.gmra.mxu1 %vm650_vm3, %v1719_v33 }
  0x31   : > { %835 = vrot.lane.b32.xlu1 %v1708_v27, %s1745_s13 }
  0x33   : > { %1604 = vmatmul.mubr.msk.bf16.gmra.mxu0 %vm518_vm4, %v501_v46 }
  0x34   : > { %1607 = vmatprep.mubr.msk.bf16.mxu0 %vm518_vm4, %v509_v49 }
  0x35   : > { %1120 = vrot.lane.b32.xlu1 %v1105_v37, %s1745_s13 }
  0x3b   : > { %1608 = vmatmul.mubr.msk.bf16.gmra.mxu0 %vm518_vm4, %v517_v52 }
  0x83   : > { %v822_v53 = vpop.permute.xlu0 %821 }
  0x84   : > { %1631 = vmatprep.mubr.msk.bf16.mxu0 %vm518_vm4, %v822_v53 }
  0x87   : > { %v824_v54 = vpop.permute.xlu0 %823 }
  0x88   : > { %1632 = vmatmul.mubr.msk.bf16.vlgmr.msra.gmra.mxu0 %vm518_vm4, %v824_v54 }
  0x8b   : > { %v826_v55 = vpop.permute.xlu0 %825  ;;  %v1107_v56 = vpop.permute.xlu1 %1106 }
  0x8c   : > { %1635 = vmatprep.mubr.msk.bf16.mxu0 %vm518_vm4, %v826_v55  ;;  %1649 = vmatprep.mubr.msk.bf16.mxu1 %vm1122_vm5, %v1107_v56 }
  0x8f   : > { %v1111_v57 = vpop.permute.xlu0 %1110  ;;  %v1109_v58 = vpop.permute.xlu1 %1108 }
  0x90   : > { %1650 = vmatmul.mubr.msk.bf16.vlgmr.msra.gmra.mxu1 %vm1122_vm5, %v1109_v58 }
  0x91   : > { %1653 = vmatprep.mubr.msk.bf16.mxu1 %vm1122_vm5, %v1111_v57 }
  0x93   : > { %v830_v59 = vpop.permute.xlu0 %829  ;;  %v828_v60 = vpop.permute.xlu1 %827 }
  0x94   : > { %1636 = vmatmul.mubr.msk.bf16.gmra.mxu0 %vm518_vm4, %v828_v60 }
  0x95   : > { %1639 = vmatprep.mubr.msk.bf16.mxu0 %vm518_vm4, %v830_v59 }
  0x97   : > { %v1115_v61 = vpop.permute.xlu0 %1114  ;;  %v1113_v62 = vpop.permute.xlu1 %1112 }
  0x98   : > { %1654 = vmatmul.mubr.msk.bf16.gmra.mxu1 %vm1122_vm5, %v1113_v62 }
  0x99   : > { %1657 = vmatprep.mubr.msk.bf16.mxu1 %vm1122_vm5, %v1115_v61 }
  0x9b   : > { %v834_v63 = vpop.permute.xlu0 %833  ;;  %v832_v0 = vpop.permute.xlu1 %831 }
  0x9c   : > { %1640 = vmatmul.mubr.msk.bf16.gmra.mxu0 %vm518_vm4, %v832_v0 }
  0x9d   : > { %1643 = vmatprep.mubr.msk.bf16.mxu0 %vm518_vm4, %v834_v63 }
  0x9f   : > { %v1119_v1 = vpop.permute.xlu0 %1118  ;;  %v1117_v2 = vpop.permute.xlu1 %1116 }
  0xa0   : > { %1658 = vmatmul.mubr.msk.bf16.gmra.mxu1 %vm1122_vm5, %v1117_v2 }
  0xa1   : > { %1661 = vmatprep.mubr.msk.bf16.mxu1 %vm1122_vm5, %v1119_v1 }
  0xa3   : > { %v836_v4 = vpop.permute.xlu1 %835 }
  0xa4   : > { %1644 = vmatmul.mubr.msk.bf16.gmra.mxu0 %vm518_vm4, %v836_v4 }
  0xa7   : > { %v1121_v5 = vpop.permute.xlu1 %1120 }
  0xa8   : > { %1662 = vmatmul.mubr.msk.bf16.gmra.mxu1 %vm1122_vm5, %v1121_v5 }
  0xd8   : > { %v1615_v9 = vpop.f32.mrf.mxu1 }
  0xda   : > { %v701_v11 = vpop.f32.mrf.mxu1 }
  0xdc   : > { %v1616_v13 = vpop.f32.mrf.mxu1 }
  0xde   : > { %v704_v15 = vpop.f32.mrf.mxu1 }
  0xe0   : > { %v1619_v17 = vpop.f32.mrf.mxu1 }
  0xe2   : > { %v717_v19 = vpop.f32.mrf.mxu1 }
  0xe3   : > { %v1597_v6 = vpop.f32.mrf.mxu0 }
  0xe4   : > { %v1620_v21 = vpop.f32.mrf.mxu1  ;;  %v710_v38 = vadd.f32 %v1615_v9, %v1597_v6 }
  0xe5   : > { %v581_v7 = vpop.f32.mrf.mxu0 }
  0xe6   : > { %v720_v3 = vpop.f32.mrf.mxu1  ;;  %v702_v41 = vadd.f32 %v701_v11, %v581_v7 }
  0xe7   : > { %v1598_v8 = vpop.f32.mrf.mxu0 }
  0xe8   : > { %v1623_v24 = vpop.f32.mrf.mxu1  ;;  %v713_v45 = vadd.f32 %v1616_v13, %v1598_v8 }
  0xe9   : > { %v584_v10 = vpop.f32.mrf.mxu0 }
  0xea   : > { %v1935_v26 = vpop.f32.mrf.mxu1  ;;  %v705_v50 = vadd.f32 %v704_v15, %v584_v10 }
  0xeb   : > { %v1601_v12 = vpop.f32.mrf.mxu0 }
  0xec   : > { %v1939_v28 = vpop.f32.mrf.mxu1  ;;  %v726_v56 = vadd.f32 %v1619_v17, %v1601_v12 }
  0xed   : > { %v597_v14 = vpop.f32.mrf.mxu0 }
  0xee   : > { %v1943_v30 = vpop.f32.mrf.mxu1  ;;  %v718_v62 = vadd.f32 %v717_v19, %v597_v14 }
  0xef   : > { %v1602_v16 = vpop.f32.mrf.mxu0 }
  0xf0   : > { %v1947_v32 = vpop.f32.mrf.mxu1  ;;  %v729_v5 = vadd.f32 %v1620_v21, %v1602_v16 }
  0xf1   : > { %v600_v18 = vpop.f32.mrf.mxu0 }
  0xf2   : > { %v1951_v34 = vpop.f32.mrf.mxu1  ;;  %v721_v11 = vadd.f32 %v720_v3, %v600_v18 }
  0xf3   : > { %v1927_v20 = vpop.f32.mrf.mxu0 }
  0xf4   : > { %v1953_v36 = vpop.f32.mrf.mxu1  ;;  %v742_v19 = vadd.f32 %v1623_v24, %v1927_v20 }
  0xf5   : > { %v1929_v22 = vpop.f32.mrf.mxu0 }
  0xf6   : > { %v1955_v39 = vpop.f32.mrf.mxu1  ;;  %v734_v18 = vadd.f32 %v1935_v26, %v1929_v22 }
  0xf7   : > { %v1931_v23 = vpop.f32.mrf.mxu0 }
  0xf8   : > { %v745_v20 = vadd.f32 %v1939_v28, %v1931_v23 }
  0xf9   : > { %v1933_v25 = vpop.f32.mrf.mxu0 }
  0xfa   : > { %v737_v22 = vadd.f32 %v1943_v30, %v1933_v25 }
  0xfb   : > { %v1937_v27 = vpop.f32.mrf.mxu0 }
  0xfc   : > { %v758_v23 = vadd.f32 %v1947_v32, %v1937_v27 }
  0xfd   : > { %v1941_v29 = vpop.f32.mrf.mxu0 }
  0xfe   : > { %v750_v25 = vadd.f32 %v1951_v34, %v1941_v29 }
  0xff   : > { %v1945_v31 = vpop.f32.mrf.mxu0 }
 0x100   : > { %v761_v27 = vadd.f32 %v1953_v36, %v1945_v31 }
 0x101   : > { %v1949_v33 = vpop.f32.mrf.mxu0 }
 0x102   : > { %v753_v34 = vadd.f32 %v1955_v39, %v1949_v33 }
 0x148   : > { %v1633_v35 = vpop.f32.mrf.mxu0 }
 0x149   : > { %v963_v42 = vadd.f32 %v1633_v35, %v710_v38 }
 0x14a   : > { %v898_v37 = vpop.f32.mrf.mxu0 }
 0x14b   : > { %v961_v46 = vadd.f32 %v898_v37, %v702_v41 }
 0x14c   : > { %v1634_v40 = vpop.f32.mrf.mxu0 }
 0x14d   : > { %v964_v51 = vadd.f32 %v1634_v40, %v713_v45 }
 0x14e   : > { %v901_v48 = vpop.f32.mrf.mxu0 }
 0x14f   : > { %v962_v57 = vadd.f32 %v901_v48, %v705_v50 }
 0x150   : > { %v1651_v43 = vpop.f32.mrf.mxu1 }
 0x151   : > { %v1250_v47 = vadd.f32 %v1651_v43, %v963_v42 }
 0x152   : > { %v1185_v49 = vpop.f32.mrf.mxu1 }
 0x153   : > { %v1273_v52 = vadd.f32 %v1961_v44, %v1250_v47  ;;  %v1248_v53 = vadd.f32 %v1185_v49, %v961_v46 }
 0x154   : > { %v1637_v54 = vpop.f32.mrf.mxu0  ;;  %v1652_v55 = vpop.f32.mrf.mxu1 }
 0x155   : > { %1289 = vst [vmem:[%s1966_s19 + $0x10] sm:$0xff] %v1273_v52  ;;  %v1271_v58 = vadd.f32 %v1961_v44, %v1248_v53  ;;  %v1251_v59 = vadd.f32 %v1652_v55, %v964_v51  ;;  %v967_v63 = vadd.f32 %v1637_v54, %v726_v56 }
 0x156   : > { %v914_v60 = vpop.f32.mrf.mxu0  ;;  %v1188_v61 = vpop.f32.mrf.mxu1 }
 0x157   : > { %1287 = vst [vmem:[%s1966_s19] sm:$0xff] %v1271_v58  ;;  %v1274_v0 = vadd.f32 %v1961_v44, %v1251_v59  ;;  %v1249_v1 = vadd.f32 %v1188_v61, %v962_v57  ;;  %v965_v6 = vadd.f32 %v914_v60, %v718_v62 }
 0x158   : > { %v1638_v2 = vpop.f32.mrf.mxu0  ;;  %v1655_v4 = vpop.f32.mrf.mxu1 }
 0x159   : > { %1290 = vst [vmem:[%s1966_s19 + $0x18] sm:$0xff] %v1274_v0  ;;  %v1272_v7 = vadd.f32 %v1961_v44, %v1249_v1  ;;  %v1254_v8 = vadd.f32 %v1655_v4, %v967_v63  ;;  %v968_v12 = vadd.f32 %v1638_v2, %v729_v5 }
 0x15a   : > { %v917_v9 = vpop.f32.mrf.mxu0  ;;  %v1201_v10 = vpop.f32.mrf.mxu1 }
 0x15b   : > { %1288 = vst [vmem:[%s1966_s19 + $0x8] sm:$0xff] %v1272_v7  ;;  %v1277_v13 = vadd.f32 %v1961_v44, %v1254_v8  ;;  %v1252_v14 = vadd.f32 %v1201_v10, %v965_v6  ;;  %v966_v16 = vadd.f32 %v917_v9, %v721_v11 }
 0x15c   : > { %v1641_v15 = vpop.f32.mrf.mxu0  ;;  %v1656_v17 = vpop.f32.mrf.mxu1 }
 0x15d   : > { %1293 = vst [vmem:[%s1966_s19 + $0x30] sm:$0xff] %v1277_v13  ;;  %v1275_v21 = vadd.f32 %v1961_v44, %v1252_v14  ;;  %v1255_v35 = vadd.f32 %v1656_v17, %v968_v12  ;;  %v971_v3 = vadd.f32 %v1641_v15, %v742_v19 }
 0x15e   : > { %v930_v37 = vpop.f32.mrf.mxu0  ;;  %v1204_v38 = vpop.f32.mrf.mxu1 }
 0x15f   : > { %1291 = vst [vmem:[%s1966_s19 + $0x20] sm:$0xff] %v1275_v21  ;;  %v1278_v40 = vadd.f32 %v1961_v44, %v1255_v35  ;;  %v1253_v41 = vadd.f32 %v1204_v38, %v966_v16  ;;  %v969_v24 = vadd.f32 %v930_v37, %v734_v18 }
 0x160   : > { %v1642_v42 = vpop.f32.mrf.mxu0  ;;  %v1659_v43 = vpop.f32.mrf.mxu1 }
 0x161   : > { %1294 = vst [vmem:[%s1966_s19 + $0x38] sm:$0xff] %v1278_v40  ;;  %v1276_v45 = vadd.f32 %v1961_v44, %v1253_v41  ;;  %v1258_v46 = vadd.f32 %v1659_v43, %v971_v3  ;;  %v972_v26 = vadd.f32 %v1642_v42, %v745_v20 }
 0x162   : > { %v933_v47 = vpop.f32.mrf.mxu0  ;;  %v1217_v48 = vpop.f32.mrf.mxu1 }
 0x163   : > { %1292 = vst [vmem:[%s1966_s19 + $0x28] sm:$0xff] %v1276_v45  ;;  %v1281_v49 = vadd.f32 %v1961_v44, %v1258_v46  ;;  %v1256_v50 = vadd.f32 %v1217_v48, %v969_v24  ;;  %v970_v28 = vadd.f32 %v933_v47, %v737_v22 }
 0x164   : > { %v1645_v51 = vpop.f32.mrf.mxu0  ;;  %v1660_v52 = vpop.f32.mrf.mxu1 }
 0x165   : > { %1297 = vst [vmem:[%s1966_s19 + $0x50] sm:$0xff] %v1281_v49  ;;  %v1279_v53 = vadd.f32 %v1961_v44, %v1256_v50  ;;  %v1259_v54 = vadd.f32 %v1660_v52, %v972_v26  ;;  %v975_v30 = vadd.f32 %v1645_v51, %v758_v23 }
 0x166   : > { %v946_v55 = vpop.f32.mrf.mxu0  ;;  %v1220_v56 = vpop.f32.mrf.mxu1 }
 0x167   : > { %1295 = vst [vmem:[%s1966_s19 + $0x40] sm:$0xff] %v1279_v53  ;;  %v1282_v57 = vadd.f32 %v1961_v44, %v1259_v54  ;;  %v1257_v58 = vadd.f32 %v1220_v56, %v970_v28  ;;  %v973_v32 = vadd.f32 %v946_v55, %v750_v25 }
 0x168   : > { %v1646_v59 = vpop.f32.mrf.mxu0  ;;  %v1663_v60 = vpop.f32.mrf.mxu1 }
 0x169   : > { %1298 = vst [vmem:[%s1966_s19 + $0x58] sm:$0xff] %v1282_v57  ;;  %v1280_v61 = vadd.f32 %v1961_v44, %v1257_v58  ;;  %v1262_v62 = vadd.f32 %v1663_v60, %v975_v30  ;;  %v976_v0 = vadd.f32 %v1646_v59, %v761_v27 }
 0x16a   : > { %v949_v63 = vpop.f32.mrf.mxu0  ;;  %v1233_v29 = vpop.f32.mrf.mxu1 }
 0x16b   : > { %1296 = vst [vmem:[%s1966_s19 + $0x48] sm:$0xff] %v1280_v61  ;;  %v1285_v1 = vadd.f32 %v1961_v44, %v1262_v62  ;;  %v1260_v2 = vadd.f32 %v1233_v29, %v973_v32  ;;  %v974_v31 = vadd.f32 %v949_v63, %v753_v34 }
 0x16c   : > { %v1664_v4 = vpop.f32.mrf.mxu1 }
 0x16d   : > { %1301 = vst [vmem:[%s1966_s19 + $0x70] sm:$0xff] %v1285_v1  ;;  %v1283_v36 = vadd.f32 %v1961_v44, %v1260_v2  ;;  %v1263_v5 = vadd.f32 %v1664_v4, %v976_v0 }
 0x16e   : > { %v1236_v6 = vpop.f32.mrf.mxu1 }
 0x16f   : > { %1299 = vst [vmem:[%s1966_s19 + $0x60] sm:$0xff] %v1283_v36  ;;  %v1286_v7 = vadd.f32 %v1961_v44, %v1263_v5  ;;  %v1261_v8 = vadd.f32 %v1236_v6, %v974_v31 }
 0x171   : > { %1302 = vst [vmem:[%s1966_s19 + $0x78] sm:$0xff] %v1286_v7  ;;  %v1284_v33 = vadd.f32 %v1961_v44, %v1261_v8 }
 0x173   : > { %1300 = vst [vmem:[%s1966_s19 + $0x68] sm:$0xff] %v1284_v33 }
 0x174 PF: > { %s16_s23 = sadd.s32 1, %s1743_s23   ;;  %s2031_s21 = smov %s1739_s22 }
 0x175   : > { %p13_p5 = scmp.ge.s32.totalorder %s16_s23, 4   ;;  %s2032_s22 = smov %s2034_s24 }
 0x177   :  { %15 = sbr.rel (!%p13_p5) target bundleno = 2 (0x2), region = 89 }

// kernel: _conv_forward_impl.1
= control target key start
LH: loop header
LB: loop body
LE: loop exit
PB: predicated region body
PF: predicated region fallthrough
CT: control target
= control target key end

     0   :  { %s1781_s21 = smov 0   ;;  %s1783_s22 = smov 0   ;;  %s2024_s0 = inlined_call_operand.vmem [shape: bf16[2,1,160,16], index: 0, kind: input, shape index: {}]   ;;  %s2025_s1 = inlined_call_operand.vmem [shape: bf16[16,128], index: 1, kind: input, shape index: {}]   ;;  %s2026_s2 = inlined_call_operand.vmem [shape: bf16[8,128], index: 2, kind: input, shape index: {}]   ;;  %s2027_s3 = inlined_call_operand.vmem [shape: bf16[8,128], index: 3, kind: input, shape index: {}]   ;;  %s2028_s4 = inlined_call_operand.vmem [shape: bf16[4,128], index: 4, kind: input, shape index: {}]   ;;  %s2029_s5 = inlined_call_operand.vmem [shape: f32[1,128], index: 5, kind: input, shape index: {}]   ;;  %s2030_s6 = inlined_call_operand.vmem [shape: f32[2,1,128,128], index: 6, kind: output, shape index: {}]  }
   0x1   :  { %s1785_s23 = smov 0  }
   0x2 LB: > { %s31_s24 = sadd.s32 1, %s1739_s22  ;;  %p1490_p0 = scmp.ge.s32.totalorder %s1743_s23, 1  ;;  %s1743_s23 = sphi %s1785_s23, %s16_s23   ;;  %s1739_s22 = sphi %s1783_s22, %s2032_s22   ;;  %s1735_s21 = sphi %s1781_s21, %s2031_s21  }
   0x3   : > { %p33_p1 = scmp.ge.s32.totalorder %s31_s24, 2  ;;  %p285_p2 = scmp.lt.s32.totalorder %s1743_s23, 3 }
   0x5   : > { %s2034_s24 = smov (%p33_p1, %s31_s24), 0  ;;  %p286_p3 = pnand %p1490_p0, %p285_p2 }
   0x6   : > { %p345_p4 = scmp.lt.s32.totalorder (!%p286_p3), %s1735_s21, 1  ;;  %s1745_s13 = smov (!%p286_p3), 124  }
   0x7   : > { %289 = sbr.rel (%p286_p3) target bundleno = 372 (0x174), region = 44 }
   0xc   : > { %v405_v0 = vld [vmem:[%s2026_s2] sm:$0xf]  ;;  %vm543_vm0 = vcmask 1043456   ;;  %s2036_s21 = smov (!%p345_p4, %s1735_s21), 1  ;;  %vm1147_vm1 = vcmask 1041408   ;;  %vm650_vm3 = vcmask 130048  }
   0xd   : > { %v1711_v1 = vld [vmem:[%s2025_s1] sm:$0xff]   ;;  %1665 = vmatprep.subr.msk.bf16.mxu0 %vm543_vm0, %v405_v0  ;;  %v545_v2 = vsel %vm543_vm0, %v405_v0, 0  ;;  %s1668_s9 = smul.u32 80, %s2036_s21  ;;  %vm449_vm2 = vsmask.f32 7424  ;;  %vm518_vm4 = vcmask 64512  }
   0xe   : > { %v1812_v3 = vld [vmem:[%s2027_s3] sm:$0xf]  ;;  %1611 = vmatprep.subr.bf16.mxu1 %v1711_v1  ;;  %1594 = vmatpush3.bf16.msra.mxu0 %v545_v2  ;;  %vm1122_vm5 = vcmask 31744   ;;  %s1556_s14 = sshll.u32 %s2036_s21, 7 }
   0xf   : > { %v1817_v4 = vld [vmem:[%s2028_s4] sm:$0x3]  ;;  %1612 = vmatpush3.bf16.msra.mxu1 %v1711_v1  ;;  %1666 = vmatprep.subr.msk.bf16.mxu0 %vm543_vm0, %v1812_v3  ;;  %s1827_s12 = scalar_lea.vmem %s2024_s0, %s1668_s9  ;;  %s1966_s19 = scalar_lea.vmem %s2030_s6, %s1556_s14 }
  0x10   : > { %1667 = vmatprep.subr.msk.bf16.mxu1 %vm1147_vm1, %v1817_v4  ;;  %v1694_v5 = vld [vmem:[%s1827_s12 + $0x8] sm:$0xff]   ;;  %v1695_v6 = vld [vmem:[%s1827_s12 + $0x10] sm:$0xff]   ;;  %v1698_v9 = vld [vmem:[%s1827_s12 + $0x18] sm:$0xff]   ;;  %v1149_v54 = vsel %vm1147_vm1, %v1817_v4, 0 }
  0x11   : > { %821 = vrot.lane.b32.xlu0 %v1694_v5, %s1745_s13  ;;  %v1696_v7 = vld [vmem:[%s1827_s12 + $0x8] sm:$0xff]   ;;  %v1697_v8 = vld [vmem:[%s1827_s12 + $0x10] sm:$0xff]   ;;  %v1054_v14 = vshll.u32 %v1698_v9, 16  ;;  %v1699_v15 = vld [vmem:[%s1827_s12 + $0x18] sm:$0xff]   ;;  %v1058_v20 = vshrl.u32 %v1698_v9, 16 }
  0x12   : > { %v1039_v10 = vshrl.u32 %v1696_v7, 16  ;;  %v1041_v11 = vshll.u32 %v1696_v7, 16  ;;  %v1046_v12 = vshll.u32 %v1697_v8, 16  ;;  %v1050_v13 = vshrl.u32 %v1697_v8, 16  ;;  %v1701_v18 = vld [vmem:[%s1827_s12 + $0x20] sm:$0xff]   ;;  %v1702_v24 = vld [vmem:[%s1827_s12 + $0x28] sm:$0xff]  }
  0x13   : > { %v1056_v19 = vrot.slane %v1054_v14, 1  ;;  %v1062_v23 = vshll.u32 %v1701_v18, 16  ;;  %v1066_v26 = vshrl.u32 %v1701_v18, 16  ;;  %v1070_v29 = vshll.u32 %v1702_v24, 16  ;;  %v1703_v30 = vld [vmem:[%s1827_s12 + $0x28] sm:$0xff]   ;;  %v1705_v35 = vld [vmem:[%s1827_s12 + $0x30] sm:$0xff]  }
  0x14   : > { %v1043_v16 = vrot.slane %v1041_v11, 1  ;;  %v1048_v17 = vrot.slane %v1046_v12, 1  ;;  %v1074_v31 = vshrl.u32 %v1702_v24, 16  ;;  %v1706_v36 = vld [vmem:[%s1827_s12 + $0x38] sm:$0xff]   ;;  %v1700_v37 = vld [vmem:[%s1827_s12 + $0x20] sm:$0xff]   ;;  %v1078_v39 = vshll.u32 %v1705_v35, 16 }
  0x15   : > { %823 = vrot.lane.b32.xlu0 %v1695_v6, %s1745_s13  ;;  %v1060_v25 = vor.u32 %v1058_v20, %v1056_v19  ;;  %v1064_v28 = vrot.slane %v1062_v23, 1  ;;  %v1072_v34 = vrot.slane %v1070_v29, 1  ;;  %v1086_v40 = vshll.u32 %v1706_v36, 16  ;;  %v1851_v41 = vld [vmem:[%s1827_s12 + $0x40] sm:$0xff]   ;;  %v1707_v49 = vld [vmem:[%s1827_s12 + $0x38] sm:$0xff]   ;;  %v1713_v51 = vld [vmem:[%s1827_s12 + $0x8] sm:$0xff]  }
  0x16   : > { %v1044_v21 = vor.u32 %v1043_v16, %v1039_v10  ;;  %v1052_v22 = vor.u32 %v1050_v13, %v1048_v17  ;;  %v1080_v43 = vrot.slane %v1078_v39, 1  ;;  %v1090_v44 = vshrl.u32 %v1706_v36, 16  ;;  %v1712_v50 = vld [vmem:[%s1827_s12] sm:$0xff]   ;;  %v1714_v53 = vld [vmem:[%s1827_s12 + $0x10] sm:$0xff]   ;;  %v1715_v0 = vld [vmem:[%s1827_s12 + $0x18] sm:$0xff]  }
  0x17   : > { %v1065_v33 = vsel %vm449_vm2, %v1060_v25, %v1064_v28  ;;  %v1076_v38 = vor.u32 %v1074_v31, %v1072_v34  ;;  %v1068_v42 = vor.u32 %v1066_v26, %v1064_v28  ;;  %v1094_v45 = vshll.u32 %v1851_v41, 16  ;;  %v1704_v55 = vld [vmem:[%s1827_s12 + $0x30] sm:$0xff]   ;;  %v1710_v58 = vld [vmem:[%s1827_s12 + $0x48] ss:$0 sps:$4 sm:$0x11]   ;;  %1613 = vmatprep.mubr.msk.bf16.mxu1 %vm650_vm3, %v1712_v50  ;;  %v1716_v1 = vld [vmem:[%s1827_s12 + $0x20] sm:$0xff]  }
  0x18   : > { %v1049_v27 = vsel %vm449_vm2, %v1044_v21, %v1048_v17  ;;  %v1057_v32 = vsel %vm449_vm2, %v1052_v22, %v1056_v19  ;;  %v1082_v47 = vshrl.u32 %v1705_v35, 16  ;;  %v1088_v48 = vrot.slane %v1086_v40, 1  ;;  %1614 = vmatmul.mubr.msk.bf16.vlgmr.msra.gmra.mxu1 %vm650_vm3, %v1713_v51  ;;  %v1717_v5 = vld [vmem:[%s1827_s12 + $0x28] sm:$0xff]   ;;  %v1718_v26 = vld [vmem:[%s1827_s12 + $0x30] sm:$0xff]  }
  0x19   : > { %825 = vrot.lane.b32.xlu0 %v1699_v15, %s1745_s13  ;;  %1106 = vrot.lane.b32.xlu1 %v1049_v27, %s1745_s13  ;;  %v1081_v46 = vsel %vm449_vm2, %v1076_v38, %v1080_v43  ;;  %v1073_v52 = vsel %vm449_vm2, %v1068_v42, %v1072_v34  ;;  %v1096_v57 = vrot.slane %v1094_v45, 1  ;;  %v451_v59 = vshrl.u32 %v1712_v50, 16  ;;  %v1708_v27 = vld [vmem:[%s1827_s12 + $0x40] sm:$0xff]  }
  0x1a   : > { %v1092_v56 = vor.u32 %v1090_v44, %v1088_v48  ;;  %v453_v60 = vshll.u32 %v1712_v50, 16  ;;  %v458_v61 = vshll.u32 %v1713_v51, 16  ;;  %v462_v62 = vshrl.u32 %v1713_v51, 16  ;;  %1617 = vmatprep.mubr.msk.bf16.mxu1 %vm650_vm3, %v1714_v53  ;;  %1648 = vmatpush3.bf16.msra.mxu1 %v1149_v54 }
  0x1b   : > { %v466_v63 = vshll.u32 %v1714_v53, 16  ;;  %v1084_v2 = vor.u32 %v1082_v47, %v1080_v43  ;;  %v470_v4 = vshrl.u32 %v1714_v53, 16  ;;  %v474_v9 = vshll.u32 %v1715_v0, 16  ;;  %v1720_v43 = vld [vmem:[%s1827_s12 + $0x40] ss:$0 sps:$4 sm:$0x11]  }
  0x1c   : > { %v455_v6 = vrot.slane %v453_v60, 1  ;;  %v460_v7 = vrot.slane %v458_v61, 1  ;;  %v1097_v10 = vsel %vm449_vm2, %v1092_v56, %v1096_v57  ;;  %v862_v11 = vsel %vm543_vm0, %v1812_v3, 0 }
  0x1d   : > { %1110 = vrot.lane.b32.xlu0 %v1065_v33, %s1745_s13  ;;  %1108 = vrot.lane.b32.xlu1 %v1057_v32, %s1745_s13  ;;  %v468_v8 = vrot.slane %v466_v63, 1  ;;  %v482_v12 = vshll.u32 %v1716_v1, 16  ;;  %v476_v16 = vrot.slane %v474_v9, 1  ;;  %v1089_v17 = vsel %vm449_vm2, %v1084_v2, %v1088_v48  ;;  %v1719_v33 = vld [vmem:[%s1827_s12 + $0x38] sm:$0xff]  }
  0x1e   : > { %v456_v13 = vor.u32 %v455_v6, %v451_v59  ;;  %v464_v14 = vor.u32 %v462_v62, %v460_v7  ;;  %v1098_v18 = vshrl.u32 %v1851_v41, 16  ;;  %v1102_v19 = vshll.u32 %v1710_v58, 16 }
  0x1f   : > { %v472_v15 = vor.u32 %v470_v4, %v468_v8  ;;  %v478_v20 = vshrl.u32 %v1715_v0, 16  ;;  %v486_v3 = vshrl.u32 %v1716_v1, 16  ;;  %v490_v23 = vshll.u32 %v1717_v5, 16 }
  0x20   : > { %v461_v21 = vsel %vm449_vm2, %v456_v13, %v460_v7  ;;  %v469_v22 = vsel %vm449_vm2, %v464_v14, %v468_v8  ;;  %v484_v25 = vrot.slane %v482_v12, 1  ;;  %1618 = vmatmul.mubr.msk.bf16.gmra.mxu1 %vm650_vm3, %v1715_v0  ;;  %v1100_v29 = vor.u32 %v1098_v18, %v1096_v57 }
  0x21   : > { %829 = vrot.lane.b32.xlu0 %v1703_v30, %s1745_s13  ;;  %827 = vrot.lane.b32.xlu1 %v1700_v37, %s1745_s13  ;;  %v477_v24 = vsel %vm449_vm2, %v472_v15, %v476_v16  ;;  %v480_v28 = vor.u32 %v478_v20, %v476_v16  ;;  %v1104_v30 = vrot.slane %v1102_v19, 1  ;;  %v492_v32 = vrot.slane %v490_v23, 1 }
  0x22   : > { %1595 = vmatprep.mubr.msk.bf16.mxu0 %vm518_vm4, %v461_v21  ;;  %v488_v31 = vor.u32 %v486_v3, %v484_v25  ;;  %1621 = vmatprep.mubr.msk.bf16.mxu1 %vm650_vm3, %v1716_v1  ;;  %v498_v34 = vshll.u32 %v1718_v26, 16  ;;  %v494_v36 = vshrl.u32 %v1717_v5, 16  ;;  %v502_v39 = vshrl.u32 %v1718_v26, 16 }
  0x23   : > { %1596 = vmatmul.mubr.msk.bf16.vlgmr.msra.gmra.mxu0 %vm518_vm4, %v469_v22  ;;  %v485_v35 = vsel %vm449_vm2, %v480_v28, %v484_v25  ;;  %v1105_v37 = vsel %vm449_vm2, %v1100_v29, %v1104_v30  ;;  %v506_v40 = vshll.u32 %v1719_v33, 16  ;;  %v510_v47 = vshrl.u32 %v1719_v33, 16 }
  0x24   : > { %1630 = vmatpush3.bf16.msra.mxu0 %v862_v11  ;;  %1599 = vmatprep.mubr.msk.bf16.mxu0 %vm518_vm4, %v477_v24  ;;  %v493_v38 = vsel %vm449_vm2, %v488_v31, %v492_v32  ;;  %v500_v41 = vrot.slane %v498_v34, 1  ;;  %v496_v42 = vor.u32 %v494_v36, %v492_v32  ;;  %v514_v48 = vshll.u32 %v1720_v43, 16 }
  0x25   : > { %1114 = vrot.lane.b32.xlu0 %v1081_v46, %s1745_s13  ;;  %1112 = vrot.lane.b32.xlu1 %v1073_v52, %s1745_s13  ;;  %v508_v45 = vrot.slane %v506_v40, 1 }
  0x26   : > { %v504_v44 = vor.u32 %v502_v39, %v500_v41  ;;  %v501_v46 = vsel %vm449_vm2, %v496_v42, %v500_v41  ;;  %v516_v51 = vrot.slane %v514_v48, 1 }
  0x27   : > { %v512_v50 = vor.u32 %v510_v47, %v508_v45 }
  0x28   : > { %1622 = vmatmul.mubr.msk.bf16.gmra.mxu1 %vm650_vm3, %v1717_v5 }
  0x29   : > { %833 = vrot.lane.b32.xlu0 %v1707_v49, %s1745_s13  ;;  %831 = vrot.lane.b32.xlu1 %v1704_v55, %s1745_s13  ;;  %v509_v49 = vsel %vm449_vm2, %v504_v44, %v508_v45  ;;  %v517_v52 = vsel %vm449_vm2, %v512_v50, %v516_v51  ;;  %v1961_v44 = vld [vmem:[%s2029_s5] ss:$0 sm:$0xff] }
  0x2a   : > { %1625 = vmatprep.mubr.msk.bf16.mxu1 %vm650_vm3, %v1718_v26 }
  0x2b   : > { %1600 = vmatmul.mubr.msk.bf16.gmra.mxu0 %vm518_vm4, %v485_v35 }
  0x2c   : > { %1603 = vmatprep.mubr.msk.bf16.mxu0 %vm518_vm4, %v493_v38 }
  0x2d   : > { %1118 = vrot.lane.b32.xlu0 %v1097_v10, %s1745_s13  ;;  %1116 = vrot.lane.b32.xlu1 %v1089_v17, %s1745_s13 }
  0x30   : > { %1626 = vmatmul.mubr.msk.bf16.gmra.mxu1 %vm650_vm3, %v1719_v33 }
  0x31   : > { %835 = vrot.lane.b32.xlu1 %v1708_v27, %s1745_s13 }
  0x33   : > { %1604 = vmatmul.mubr.msk.bf16.gmra.mxu0 %vm518_vm4, %v501_v46 }
  0x34   : > { %1607 = vmatprep.mubr.msk.bf16.mxu0 %vm518_vm4, %v509_v49 }
  0x35   : > { %1120 = vrot.lane.b32.xlu1 %v1105_v37, %s1745_s13 }
  0x3b   : > { %1608 = vmatmul.mubr.msk.bf16.gmra.mxu0 %vm518_vm4, %v517_v52 }
  0x83   : > { %v822_v53 = vpop.permute.xlu0 %821 }
  0x84   : > { %1631 = vmatprep.mubr.msk.bf16.mxu0 %vm518_vm4, %v822_v53 }
  0x87   : > { %v824_v54 = vpop.permute.xlu0 %823 }
  0x88   : > { %1632 = vmatmul.mubr.msk.bf16.vlgmr.msra.gmra.mxu0 %vm518_vm4, %v824_v54 }
  0x8b   : > { %v826_v55 = vpop.permute.xlu0 %825  ;;  %v1107_v56 = vpop.permute.xlu1 %1106 }
  0x8c   : > { %1635 = vmatprep.mubr.msk.bf16.mxu0 %vm518_vm4, %v826_v55  ;;  %1649 = vmatprep.mubr.msk.bf16.mxu1 %vm1122_vm5, %v1107_v56 }
  0x8f   : > { %v1111_v57 = vpop.permute.xlu0 %1110  ;;  %v1109_v58 = vpop.permute.xlu1 %1108 }
  0x90   : > { %1650 = vmatmul.mubr.msk.bf16.vlgmr.msra.gmra.mxu1 %vm1122_vm5, %v1109_v58 }
  0x91   : > { %1653 = vmatprep.mubr.msk.bf16.mxu1 %vm1122_vm5, %v1111_v57 }
  0x93   : > { %v830_v59 = vpop.permute.xlu0 %829  ;;  %v828_v60 = vpop.permute.xlu1 %827 }
  0x94   : > { %1636 = vmatmul.mubr.msk.bf16.gmra.mxu0 %vm518_vm4, %v828_v60 }
  0x95   : > { %1639 = vmatprep.mubr.msk.bf16.mxu0 %vm518_vm4, %v830_v59 }
  0x97   : > { %v1115_v61 = vpop.permute.xlu0 %1114  ;;  %v1113_v62 = vpop.permute.xlu1 %1112 }
  0x98   : > { %1654 = vmatmul.mubr.msk.bf16.gmra.mxu1 %vm1122_vm5, %v1113_v62 }
  0x99   : > { %1657 = vmatprep.mubr.msk.bf16.mxu1 %vm1122_vm5, %v1115_v61 }
  0x9b   : > { %v834_v63 = vpop.permute.xlu0 %833  ;;  %v832_v0 = vpop.permute.xlu1 %831 }
  0x9c   : > { %1640 = vmatmul.mubr.msk.bf16.gmra.mxu0 %vm518_vm4, %v832_v0 }
  0x9d   : > { %1643 = vmatprep.mubr.msk.bf16.mxu0 %vm518_vm4, %v834_v63 }
  0x9f   : > { %v1119_v1 = vpop.permute.xlu0 %1118  ;;  %v1117_v2 = vpop.permute.xlu1 %1116 }
  0xa0   : > { %1658 = vmatmul.mubr.msk.bf16.gmra.mxu1 %vm1122_vm5, %v1117_v2 }
  0xa1   : > { %1661 = vmatprep.mubr.msk.bf16.mxu1 %vm1122_vm5, %v1119_v1 }
  0xa3   : > { %v836_v4 = vpop.permute.xlu1 %835 }
  0xa4   : > { %1644 = vmatmul.mubr.msk.bf16.gmra.mxu0 %vm518_vm4, %v836_v4 }
  0xa7   : > { %v1121_v5 = vpop.permute.xlu1 %1120 }
  0xa8   : > { %1662 = vmatmul.mubr.msk.bf16.gmra.mxu1 %vm1122_vm5, %v1121_v5 }
  0xd8   : > { %v1615_v9 = vpop.f32.mrf.mxu1 }
  0xda   : > { %v701_v11 = vpop.f32.mrf.mxu1 }
  0xdc   : > { %v1616_v13 = vpop.f32.mrf.mxu1 }
  0xde   : > { %v704_v15 = vpop.f32.mrf.mxu1 }
  0xe0   : > { %v1619_v17 = vpop.f32.mrf.mxu1 }
  0xe2   : > { %v717_v19 = vpop.f32.mrf.mxu1 }
  0xe3   : > { %v1597_v6 = vpop.f32.mrf.mxu0 }
  0xe4   : > { %v1620_v21 = vpop.f32.mrf.mxu1  ;;  %v710_v38 = vadd.f32 %v1615_v9, %v1597_v6 }
  0xe5   : > { %v581_v7 = vpop.f32.mrf.mxu0 }
  0xe6   : > { %v720_v3 = vpop.f32.mrf.mxu1  ;;  %v702_v41 = vadd.f32 %v701_v11, %v581_v7 }
  0xe7   : > { %v1598_v8 = vpop.f32.mrf.mxu0 }
  0xe8   : > { %v1623_v24 = vpop.f32.mrf.mxu1  ;;  %v713_v45 = vadd.f32 %v1616_v13, %v1598_v8 }
  0xe9   : > { %v584_v10 = vpop.f32.mrf.mxu0 }
  0xea   : > { %v1935_v26 = vpop.f32.mrf.mxu1  ;;  %v705_v50 = vadd.f32 %v704_v15, %v584_v10 }
  0xeb   : > { %v1601_v12 = vpop.f32.mrf.mxu0 }
  0xec   : > { %v1939_v28 = vpop.f32.mrf.mxu1  ;;  %v726_v56 = vadd.f32 %v1619_v17, %v1601_v12 }
  0xed   : > { %v597_v14 = vpop.f32.mrf.mxu0 }
  0xee   : > { %v1943_v30 = vpop.f32.mrf.mxu1  ;;  %v718_v62 = vadd.f32 %v717_v19, %v597_v14 }
  0xef   : > { %v1602_v16 = vpop.f32.mrf.mxu0 }
  0xf0   : > { %v1947_v32 = vpop.f32.mrf.mxu1  ;;  %v729_v5 = vadd.f32 %v1620_v21, %v1602_v16 }
  0xf1   : > { %v600_v18 = vpop.f32.mrf.mxu0 }
  0xf2   : > { %v1951_v34 = vpop.f32.mrf.mxu1  ;;  %v721_v11 = vadd.f32 %v720_v3, %v600_v18 }
  0xf3   : > { %v1927_v20 = vpop.f32.mrf.mxu0 }
  0xf4   : > { %v1953_v36 = vpop.f32.mrf.mxu1  ;;  %v742_v19 = vadd.f32 %v1623_v24, %v1927_v20 }
  0xf5   : > { %v1929_v22 = vpop.f32.mrf.mxu0 }
  0xf6   : > { %v1955_v39 = vpop.f32.mrf.mxu1  ;;  %v734_v18 = vadd.f32 %v1935_v26, %v1929_v22 }
  0xf7   : > { %v1931_v23 = vpop.f32.mrf.mxu0 }
  0xf8   : > { %v745_v20 = vadd.f32 %v1939_v28, %v1931_v23 }
  0xf9   : > { %v1933_v25 = vpop.f32.mrf.mxu0 }
  0xfa   : > { %v737_v22 = vadd.f32 %v1943_v30, %v1933_v25 }
  0xfb   : > { %v1937_v27 = vpop.f32.mrf.mxu0 }
  0xfc   : > { %v758_v23 = vadd.f32 %v1947_v32, %v1937_v27 }
  0xfd   : > { %v1941_v29 = vpop.f32.mrf.mxu0 }
  0xfe   : > { %v750_v25 = vadd.f32 %v1951_v34, %v1941_v29 }
  0xff   : > { %v1945_v31 = vpop.f32.mrf.mxu0 }
 0x100   : > { %v761_v27 = vadd.f32 %v1953_v36, %v1945_v31 }
 0x101   : > { %v1949_v33 = vpop.f32.mrf.mxu0 }
 0x102   : > { %v753_v34 = vadd.f32 %v1955_v39, %v1949_v33 }
 0x148   : > { %v1633_v35 = vpop.f32.mrf.mxu0 }
 0x149   : > { %v963_v42 = vadd.f32 %v1633_v35, %v710_v38 }
 0x14a   : > { %v898_v37 = vpop.f32.mrf.mxu0 }
 0x14b   : > { %v961_v46 = vadd.f32 %v898_v37, %v702_v41 }
 0x14c   : > { %v1634_v40 = vpop.f32.mrf.mxu0 }
 0x14d   : > { %v964_v51 = vadd.f32 %v1634_v40, %v713_v45 }
 0x14e   : > { %v901_v48 = vpop.f32.mrf.mxu0 }
 0x14f   : > { %v962_v57 = vadd.f32 %v901_v48, %v705_v50 }
 0x150   : > { %v1651_v43 = vpop.f32.mrf.mxu1 }
 0x151   : > { %v1250_v47 = vadd.f32 %v1651_v43, %v963_v42 }
 0x152   : > { %v1185_v49 = vpop.f32.mrf.mxu1 }
 0x153   : > { %v1273_v52 = vadd.f32 %v1961_v44, %v1250_v47  ;;  %v1248_v53 = vadd.f32 %v1185_v49, %v961_v46 }
 0x154   : > { %v1637_v54 = vpop.f32.mrf.mxu0  ;;  %v1652_v55 = vpop.f32.mrf.mxu1 }
 0x155   : > { %1289 = vst [vmem:[%s1966_s19 + $0x10] sm:$0xff] %v1273_v52  ;;  %v1271_v58 = vadd.f32 %v1961_v44, %v1248_v53  ;;  %v1251_v59 = vadd.f32 %v1652_v55, %v964_v51  ;;  %v967_v63 = vadd.f32 %v1637_v54, %v726_v56 }
 0x156   : > { %v914_v60 = vpop.f32.mrf.mxu0  ;;  %v1188_v61 = vpop.f32.mrf.mxu1 }
 0x157   : > { %1287 = vst [vmem:[%s1966_s19] sm:$0xff] %v1271_v58  ;;  %v1274_v0 = vadd.f32 %v1961_v44, %v1251_v59  ;;  %v1249_v1 = vadd.f32 %v1188_v61, %v962_v57  ;;  %v965_v6 = vadd.f32 %v914_v60, %v718_v62 }
 0x158   : > { %v1638_v2 = vpop.f32.mrf.mxu0  ;;  %v1655_v4 = vpop.f32.mrf.mxu1 }
 0x159   : > { %1290 = vst [vmem:[%s1966_s19 + $0x18] sm:$0xff] %v1274_v0  ;;  %v1272_v7 = vadd.f32 %v1961_v44, %v1249_v1  ;;  %v1254_v8 = vadd.f32 %v1655_v4, %v967_v63  ;;  %v968_v12 = vadd.f32 %v1638_v2, %v729_v5 }
 0x15a   : > { %v917_v9 = vpop.f32.mrf.mxu0  ;;  %v1201_v10 = vpop.f32.mrf.mxu1 }
 0x15b   : > { %1288 = vst [vmem:[%s1966_s19 + $0x8] sm:$0xff] %v1272_v7  ;;  %v1277_v13 = vadd.f32 %v1961_v44, %v1254_v8  ;;  %v1252_v14 = vadd.f32 %v1201_v10, %v965_v6  ;;  %v966_v16 = vadd.f32 %v917_v9, %v721_v11 }
 0x15c   : > { %v1641_v15 = vpop.f32.mrf.mxu0  ;;  %v1656_v17 = vpop.f32.mrf.mxu1 }
 0x15d   : > { %1293 = vst [vmem:[%s1966_s19 + $0x30] sm:$0xff] %v1277_v13  ;;  %v1275_v21 = vadd.f32 %v1961_v44, %v1252_v14  ;;  %v1255_v35 = vadd.f32 %v1656_v17, %v968_v12  ;;  %v971_v3 = vadd.f32 %v1641_v15, %v742_v19 }
 0x15e   : > { %v930_v37 = vpop.f32.mrf.mxu0  ;;  %v1204_v38 = vpop.f32.mrf.mxu1 }
 0x15f   : > { %1291 = vst [vmem:[%s1966_s19 + $0x20] sm:$0xff] %v1275_v21  ;;  %v1278_v40 = vadd.f32 %v1961_v44, %v1255_v35  ;;  %v1253_v41 = vadd.f32 %v1204_v38, %v966_v16  ;;  %v969_v24 = vadd.f32 %v930_v37, %v734_v18 }
 0x160   : > { %v1642_v42 = vpop.f32.mrf.mxu0  ;;  %v1659_v43 = vpop.f32.mrf.mxu1 }
 0x161   : > { %1294 = vst [vmem:[%s1966_s19 + $0x38] sm:$0xff] %v1278_v40  ;;  %v1276_v45 = vadd.f32 %v1961_v44, %v1253_v41  ;;  %v1258_v46 = vadd.f32 %v1659_v43, %v971_v3  ;;  %v972_v26 = vadd.f32 %v1642_v42, %v745_v20 }
 0x162   : > { %v933_v47 = vpop.f32.mrf.mxu0  ;;  %v1217_v48 = vpop.f32.mrf.mxu1 }
 0x163   : > { %1292 = vst [vmem:[%s1966_s19 + $0x28] sm:$0xff] %v1276_v45  ;;  %v1281_v49 = vadd.f32 %v1961_v44, %v1258_v46  ;;  %v1256_v50 = vadd.f32 %v1217_v48, %v969_v24  ;;  %v970_v28 = vadd.f32 %v933_v47, %v737_v22 }
 0x164   : > { %v1645_v51 = vpop.f32.mrf.mxu0  ;;  %v1660_v52 = vpop.f32.mrf.mxu1 }
 0x165   : > { %1297 = vst [vmem:[%s1966_s19 + $0x50] sm:$0xff] %v1281_v49  ;;  %v1279_v53 = vadd.f32 %v1961_v44, %v1256_v50  ;;  %v1259_v54 = vadd.f32 %v1660_v52, %v972_v26  ;;  %v975_v30 = vadd.f32 %v1645_v51, %v758_v23 }
 0x166   : > { %v946_v55 = vpop.f32.mrf.mxu0  ;;  %v1220_v56 = vpop.f32.mrf.mxu1 }
 0x167   : > { %1295 = vst [vmem:[%s1966_s19 + $0x40] sm:$0xff] %v1279_v53  ;;  %v1282_v57 = vadd.f32 %v1961_v44, %v1259_v54  ;;  %v1257_v58 = vadd.f32 %v1220_v56, %v970_v28  ;;  %v973_v32 = vadd.f32 %v946_v55, %v750_v25 }
 0x168   : > { %v1646_v59 = vpop.f32.mrf.mxu0  ;;  %v1663_v60 = vpop.f32.mrf.mxu1 }
 0x169   : > { %1298 = vst [vmem:[%s1966_s19 + $0x58] sm:$0xff] %v1282_v57  ;;  %v1280_v61 = vadd.f32 %v1961_v44, %v1257_v58  ;;  %v1262_v62 = vadd.f32 %v1663_v60, %v975_v30  ;;  %v976_v0 = vadd.f32 %v1646_v59, %v761_v27 }
 0x16a   : > { %v949_v63 = vpop.f32.mrf.mxu0  ;;  %v1233_v29 = vpop.f32.mrf.mxu1 }
 0x16b   : > { %1296 = vst [vmem:[%s1966_s19 + $0x48] sm:$0xff] %v1280_v61  ;;  %v1285_v1 = vadd.f32 %v1961_v44, %v1262_v62  ;;  %v1260_v2 = vadd.f32 %v1233_v29, %v973_v32  ;;  %v974_v31 = vadd.f32 %v949_v63, %v753_v34 }
 0x16c   : > { %v1664_v4 = vpop.f32.mrf.mxu1 }
 0x16d   : > { %1301 = vst [vmem:[%s1966_s19 + $0x70] sm:$0xff] %v1285_v1  ;;  %v1283_v36 = vadd.f32 %v1961_v44, %v1260_v2  ;;  %v1263_v5 = vadd.f32 %v1664_v4, %v976_v0 }
 0x16e   : > { %v1236_v6 = vpop.f32.mrf.mxu1 }
 0x16f   : > { %1299 = vst [vmem:[%s1966_s19 + $0x60] sm:$0xff] %v1283_v36  ;;  %v1286_v7 = vadd.f32 %v1961_v44, %v1263_v5  ;;  %v1261_v8 = vadd.f32 %v1236_v6, %v974_v31 }
 0x171   : > { %1302 = vst [vmem:[%s1966_s19 + $0x78] sm:$0xff] %v1286_v7  ;;  %v1284_v33 = vadd.f32 %v1961_v44, %v1261_v8 }
 0x173   : > { %1300 = vst [vmem:[%s1966_s19 + $0x68] sm:$0xff] %v1284_v33 }
 0x174 PF: > { %s16_s23 = sadd.s32 1, %s1743_s23   ;;  %s2031_s21 = smov %s1739_s22 }
 0x175   : > { %p13_p5 = scmp.ge.s32.totalorder %s16_s23, 4   ;;  %s2032_s22 = smov %s2034_s24 }
 0x177   :  { %15 = sbr.rel (!%p13_p5) target bundleno = 2 (0x2), region = 89 }

</bundles_post_ra>
